<compile_context>
chip_gen: v6e
topology: v6e:2x2x1
jax: 0.10.0
libtpu: 0.0.40
codegen_flags: <defaults>
</compile_context>

<pallas_src>
import jax
import jax.numpy as jnp
import numpy as np
from jax import lax
from jax.experimental import pallas as pl
from jax.experimental.pallas import tpu as pltpu

_PAR1 = pltpu.CompilerParams(dimension_semantics=("parallel",))


# ----------------------------------------------------------------------------
# Bilinear interpolation matrices (exactly F.interpolate, bilinear,
# align_corners=False, including edge clamping). Built/composed in float64.
# ----------------------------------------------------------------------------
def _bilinear_matrix_np(out_size: int, in_size: int) -> np.ndarray:
    i = np.arange(out_size, dtype=np.float64)
    src = (i + 0.5) * (in_size / out_size) - 0.5
    src = np.clip(src, 0.0, None)                       # PyTorch clamps negatives to 0
    i0 = np.minimum(np.floor(src).astype(np.int64), in_size - 1)
    i1 = np.minimum(i0 + 1, in_size - 1)
    lam = np.clip(src - i0, 0.0, 1.0)
    w = np.zeros((out_size, in_size), dtype=np.float64)
    w[np.arange(out_size), i0] += 1.0 - lam
    w[np.arange(out_size), i1] += lam
    return w


# ----------------------------------------------------------------------------
# Kernel 1: batched bilinear upsample (image -> 256x256, *255), bf16 output
# ----------------------------------------------------------------------------
def _resize_image_kernel(x_ref, wwT_ref, wh_ref, o_ref):
    nb, hi, wi = x_ref.shape
    x = x_ref[...]
    # Width expansion first, stacked over the whole chunk -> lane-dense
    # (nb*hi, out_w) intermediate with MXU M = nb*hi.
    t = jnp.dot(x.reshape(nb * hi, wi), wwT_ref[...],
                preferred_element_type=jnp.float32)
    t = t.reshape(nb, hi, -1)
    wh = wh_ref[...]
    for n in range(nb):                                   # static unroll, nb <= 8
        y = jnp.dot(wh, t[n], preferred_element_type=jnp.float32)
        o_ref[n] = y.astype(o_ref.dtype)


def resize_image_pallas(x, out_hw, scale=255.0, out_dtype=jnp.bfloat16, max_nb=8):
    """x: (B, hi, wi) f32 -> (B, out_hw, out_hw) out_dtype, values * scale."""
    b, hi, wi = x.shape
    nb = min(max_nb, b)
    wh = jnp.asarray((scale * _bilinear_matrix_np(out_hw, hi)).astype(np.float32))
    wwT = jnp.asarray(_bilinear_matrix_np(out_hw, wi).T.astype(np.float32))
    return pl.pallas_call(
        _resize_image_kernel,
        out_shape=jax.ShapeDtypeStruct((b, out_hw, out_hw), out_dtype),
        grid=(pl.cdiv(b, nb),),
        in_specs=[
            pl.BlockSpec((nb, hi, wi), lambda i: (i, 0, 0)),
            pl.BlockSpec((wi, out_hw), lambda i: (0, 0)),
            pl.BlockSpec((out_hw, hi), lambda i: (0, 0)),
        ],
        out_specs=pl.BlockSpec((nb, out_hw, out_hw), lambda i: (i, 0, 0)),
        compiler_params=_PAR1,
    )(x, wwT, wh)


# ----------------------------------------------------------------------------
# Kernel 2: patch embedding (synthetic image encoder), bf16 MXU, f32 accumulate
# ----------------------------------------------------------------------------
def _patch_embed_kernel(x_ref, w_ref, b_ref, o_ref):
    acc = jnp.dot(x_ref[...], w_ref[...], preferred_element_type=jnp.float32)
    o_ref[...] = (acc + b_ref[...]).astype(o_ref.dtype)


def patch_embed_pallas(x, w, b, out_dtype=jnp.bfloat16, max_tile_m=1024):
    """x: (M, F) bf16, w: (F, C) bf16, b: (C,) f32 -> (M, C) (batch folded into M)."""
    m, f = x.shape
    c = w.shape[1]
    tile_m = min(max_tile_m, m)
    b2 = b.reshape(1, c).astype(jnp.float32)
    return pl.pallas_call(
        _patch_embed_kernel,
        out_shape=jax.ShapeDtypeStruct((m, c), out_dtype),
        grid=(pl.cdiv(m, tile_m),),
        in_specs=[
            pl.BlockSpec((tile_m, f), lambda i: (i, 0)),
            pl.BlockSpec((f, c), lambda i: (0, 0)),
            pl.BlockSpec((1, c), lambda i: (0, 0)),
        ],
        out_specs=pl.BlockSpec((tile_m, c), lambda i: (i, 0)),
        compiler_params=_PAR1,
    )(x, w, b2)


# ----------------------------------------------------------------------------
# Kernel 3: 3x3 max-pool (stride 1, pad 1) on a non-negative mask, slice+max
# ----------------------------------------------------------------------------
def _maxpool3x3_kernel(x_ref, o_ref):
    x = x_ref[...]
    nb, h, w = x.shape
    # Zero padding == -inf padding because the mask is non-negative.
    zc = jnp.zeros((nb, h, 1), jnp.float32)
    xw = jnp.concatenate([zc, x, zc], axis=2)
    v = jnp.maximum(jnp.maximum(xw[:, :, 0:w], xw[:, :, 1:w + 1]), xw[:, :, 2:w + 2])
    zr = jnp.zeros((nb, 1, w), jnp.float32)
    vh = jnp.concatenate([zr, v, zr], axis=1)
    o_ref[...] = jnp.maximum(jnp.maximum(vh[:, 0:h, :], vh[:, 1:h + 1, :]),
                             vh[:, 2:h + 2, :])


def maxpool3x3_pallas(x, max_block_bytes=2 << 20):
    """F.max_pool2d(mask, kernel_size=3, stride=1, padding=1); x: (N, h, w) f32."""
    n, h, w = x.shape
    nb = max(1, min(n, max_block_bytes // max(1, h * w * 4)))
    return pl.pallas_call(
        _maxpool3x3_kernel,
        out_shape=jax.ShapeDtypeStruct((n, h, w), jnp.float32),
        grid=(pl.cdiv(n, nb),),
        in_specs=[pl.BlockSpec((nb, h, w), lambda i: (i, 0, 0))],
        out_specs=pl.BlockSpec((nb, h, w), lambda i: (i, 0, 0)),
        compiler_params=_PAR1,
    )(x)


# ----------------------------------------------------------------------------
# Kernel 4: point-embedding x image-embedding score, gridded over the batch
# ----------------------------------------------------------------------------
def _point_score_kernel(pe_ref, emb_ref, o_ref):
    # (L, C) x (P, C) contracted on C -> lane-dense (L, P) block on the MXU.
    o_ref[...] = lax.dot_general(
        pe_ref[...], emb_ref[...],
        dimension_numbers=(((1,), (1,)), ((), ())),
        preferred_element_type=jnp.float32)


def point_score_pallas(pe, emb):
    """pe: (B, L, C) bf16, emb: (B, P, C) bf16 -> (B, L, P) f32.

    One grid step per sample: the (P, C) embedding tile is DMA'd once and all
    L prompt rows are scored in a single matmul.
    """
    b, l_cnt, c = pe.shape
    p = emb.shape[1]
    return pl.pallas_call(
        _point_score_kernel,
        out_shape=jax.ShapeDtypeStruct((b, l_cnt, p), jnp.float32),
        grid=(b,),
        in_specs=[
            pl.BlockSpec((None, l_cnt, c), lambda i: (i, 0, 0)),
            pl.BlockSpec((None, p, c), lambda i: (i, 0, 0)),
        ],
        out_specs=pl.BlockSpec((None, l_cnt, p), lambda i: (i, 0, 0)),
        compiler_params=_PAR1,
    )(pe, emb)


# ----------------------------------------------------------------------------
# Kernel 5: composed (16 -> 128 -> label_size) resize + sigmoid + label_only gate
# ----------------------------------------------------------------------------
def _resize_sigmoid_gate_kernel(g_ref, s_ref, wwT_ref, wh_ref, o_ref):
    b = pl.program_id(0)
    l_cnt = s_ref.shape[0]
    wwT = wwT_ref[...]
    wh = wh_ref[...]
    for l in range(l_cnt):                                # static unroll over labels
        t = jnp.dot(s_ref[l], wwT, preferred_element_type=jnp.float32)   # (16, out_w)
        y = jnp.dot(wh, t, preferred_element_type=jnp.float32)           # (out_h, out_w)
        o_ref[l] = jax.nn.sigmoid(y) * g_ref[b, l]                       # SMEM scalar gate


def resize_sigmoid_gate_pallas(score, gate, out_h, out_w, mid=128):
    """sigmoid(resize(resize(score, mid, mid), out_h, out_w)) * gate[..., None, None].

    score: (B, L, 16, 16) f32, gate: (B, L) f32.  The two bilinear resizes are
    composed into one matrix pair (exact by matmul associativity), so the
    (mid, mid) low-res map is never materialized.
    """
    b, l_cnt, hi, wi = score.shape
    wh = jnp.asarray((_bilinear_matrix_np(out_h, mid)
                      @ _bilinear_matrix_np(mid, hi)).astype(np.float32))
    wwT = jnp.asarray((_bilinear_matrix_np(out_w, mid)
                       @ _bilinear_matrix_np(mid, wi)).T.astype(np.float32))
    return pl.pallas_call(
        _resize_sigmoid_gate_kernel,
        out_shape=jax.ShapeDtypeStruct((b, l_cnt, out_h, out_w), jnp.float32),
        grid=(b,),
        in_specs=[
            pl.BlockSpec(memory_space=pltpu.MemorySpace.SMEM),   # gate (B, L) scalars
            pl.BlockSpec((None, l_cnt, hi, wi), lambda i: (i, 0, 0, 0)),
            pl.BlockSpec((wi, out_w), lambda i: (0, 0)),
            pl.BlockSpec((out_h, hi), lambda i: (0, 0)),
        ],
        out_specs=pl.BlockSpec((None, l_cnt, out_h, out_w), lambda i: (i, 0, 0, 0)),
        compiler_params=_PAR1,
    )(gate, score, wwT, wh)


# ----------------------------------------------------------------------------
# Plain-JAX glue (index math, point selection, fourier point embedding)
# ----------------------------------------------------------------------------
def select_point(pooled, h, w):
    """Pick a foreground point from the max-pooled mask; (N,2) = (x, y) in 256-space."""
    # TODO(synk): reference uses random.randint over nonzero indices; we pick the
    # first nonzero (row-major) deterministically.
    n = pooled.shape[0]
    flat = pooled.reshape(n, -1) > 0
    has = jnp.any(flat, axis=1)
    idx = jnp.argmax(flat, axis=1).astype(jnp.int32)
    row = jnp.where(has, idx // w, 0)
    col = jnp.where(has, idx % w, 0)
    return jnp.stack([col.astype(jnp.float32) * (256.0 / w),
                      row.astype(jnp.float32) * (256.0 / h)], axis=-1)


def point_embedding(coords, gauss):
    """SAM-style random-fourier point embedding. coords: (N,2), gauss: (2, C/2)."""
    c = coords / 256.0
    c = 2.0 * c - 1.0
    proj = (c @ gauss) * (2.0 * jnp.pi)
    return jnp.concatenate([jnp.sin(proj), jnp.cos(proj)], axis=-1)  # (N, C)


# ----------------------------------------------------------------------------
# SamusWrapper2d (synthetic-weight Pallas version)
# ----------------------------------------------------------------------------
class SamusWrapper2dPallas:
    PATCH = 16
    IMG = 256
    EMBED = 256
    LOWRES = 128

    def __init__(self, key, label_count=3, target_label_ids=(1, 2)):
        self.label_count = label_count
        self.target_label_ids = tuple(target_label_ids)
        kw, kb, kg = jax.random.split(key, 3)
        p = self.PATCH
        # Deterministic synthetic parameters (no checkpoint load).
        # TODO(synk): SAM/Samus ViT-B encoder, prompt encoder and two-way mask
        # decoder are not replicated; a patch-embedding matmul and a point/image
        # embedding dot-score stand in for them.
        self.patch_w = jax.random.normal(kw, (3 * p * p, self.EMBED), jnp.float32) * 0.02
        self.patch_b = jax.random.normal(kb, (self.EMBED,), jnp.float32) * 0.02
        self.pe_gauss = jax.random.normal(kg, (2, self.EMBED // 2), jnp.float32)
        # The 3 input channels are identical copies of the resized image, so the
        # channel axis is folded into the weight (exact in f32); MXU operands run
        # in bf16 with f32 accumulation.
        self.patch_w_eff = (
            self.patch_w.reshape(3, p * p, self.EMBED).sum(0).astype(jnp.bfloat16))
        self._forward = jax.jit(self._forward_impl)

    # ---- self.model.image_encoder (synthetic) --------------------------------
    def image_encoder(self, resized):
        """resized: (B, 256, 256) bf16 (already *255) -> (B, 256 patches, C) bf16."""
        b = resized.shape[0]
        p, g = self.PATCH, self.IMG // self.PATCH
        x = resized.reshape(b, g, p, g, p).transpose(0, 1, 3, 2, 4)
        x = x.reshape(b * g * g, p * p)
        emb = patch_embed_pallas(x, self.patch_w_eff, self.patch_b,
                                 out_dtype=jnp.bfloat16, max_tile_m=1024)
        return emb.reshape(b, g * g, self.EMBED)

    # ---- forward --------------------------------------------------------------
    def _forward_impl(self, image, label):
        bsz = image.shape[0]
        h, w = label.shape[-2:]
        nl = len(self.target_label_ids)

        # scale_image_to_samus_input_2d: bilinear -> 256x256, *255 (the 3 identical
        # channels are folded into patch_w_eff).
        x = image.reshape(bsz, h, w)
        resized = resize_image_pallas(x, self.IMG, scale=255.0)          # (B,256,256) bf16
        image_embeddings = self.image_encoder(resized)                   # (B, P, C) bf16

        # Sample-major label masks (B, L, h, w): per-sample tensors reused across L.
        ids = jnp.asarray(self.target_label_ids, jnp.int32).reshape(1, nl, 1, 1)
        masks = label[:, None, :, :] == ids                              # (B, L, h, w) bool
        maskf = masks.astype(jnp.float32).reshape(bsz * nl, h, w)

        # get_point_prompt: 3x3 max-pool, pick a foreground point, 256-space coords.
        pooled = maxpool3x3_pallas(maskf)
        coords = select_point(pooled, h, w)                              # (B*L, 2)
        pe = point_embedding(coords, self.pe_gauss).astype(jnp.bfloat16)
        pe = pe.reshape(bsz, nl, self.EMBED)                             # (B, L, C)

        # synthetic mask decoder: point-embedding x image-embedding dot score.
        score = point_score_pallas(pe, image_embeddings)                 # (B, L, P) f32
        g = self.IMG // self.PATCH
        score = score.reshape(bsz, nl, g, g)                             # (B, L, 16, 16)

        # (16,16) -> (128,128) low_res_logits -> (h,w), sigmoid, label_only gate.
        gate = jnp.any(masks, axis=(2, 3)).astype(jnp.float32)           # (B, L)
        logit = resize_sigmoid_gate_pallas(score, gate, h, w, self.LOWRES)
        pred_mask = logit > 0.5                                          # == (y>0) & gate

        logit = jnp.transpose(logit, (1, 0, 2, 3))                       # (L, B, h, w)
        pred_mask = jnp.transpose(pred_mask, (1, 0, 2, 3))
        return pred_mask, logit

    def __call__(self, image, label):
        """image: (bs,1,h,w) f32, label: (bs,h,w) int32."""
        pred_mask, logit = self._forward(image, label)
        result_logit = [None] * self.label_count
        result_mask = [None] * self.label_count
        for li, k in enumerate(self.target_label_ids):
            result_logit[k] = logit[li]
            result_mask[k] = pred_mask[li]
        return result_logit, result_mask


# ----------------------------------------------------------------------------
if __name__ == "__main__":
    key = jax.random.PRNGKey(0)
    k_img, k_lab, k_par = jax.random.split(key, 3)

    bs, h, w = 2, 16, 16
    image = jax.random.uniform(k_img, (bs, 1, h, w), dtype=jnp.float32)
    label = jax.random.randint(k_lab, (bs, h, w), 0, 3, dtype=jnp.int32)

    model = SamusWrapper2dPallas(k_par, label_count=3, target_label_ids=(1, 2))
    result_logit, result_mask = model(image, label)

    for k in model.target_label_ids:
        jax.block_until_ready(result_logit[k])
        jax.block_until_ready(result_mask[k])
        assert result_logit[k].shape == (bs, h, w)
        assert result_mask[k].shape == (bs, h, w)
        assert result_mask[k].dtype == jnp.bool_

    print("KERNEL_OK")
</pallas_src>

<mosaic_0001>
module attributes {stable_mosaic.version = 11 : i64} {
  func.func @_maxpool3x3_kernel(%arg0: i32, %arg1: memref<4x16x16xf32, #tpu.memory_space<vmem>>, %arg2: memref<4x16x16xf32, #tpu.memory_space<vmem>>) attributes {dimension_semantics = [#tpu.dimension_semantics<parallel>], iteration_bounds = array<i64: 1>, scalar_prefetch = 0 : i64, scratch_operands = 0 : i64, tpu.core_type = #tpu.core_type<tc>, window_params = [{transform_indices = @transform_0, window_bounds = array<i64: 4, 16, 16>}, {transform_indices = @transform_1, window_bounds = array<i64: 4, 16, 16>}]} {
    %c0 = arith.constant 0 : index
    %c0_0 = arith.constant 0 : index
    %c0_1 = arith.constant 0 : index
    %0 = vector.load %arg1[%c0, %c0_0, %c0_1] : memref<4x16x16xf32, #tpu.memory_space<vmem>>, vector<4x16x16xf32>
    %cst = arith.constant 0.000000e+00 : f32
    %1 = vector.broadcast %cst : f32 to vector<4x16x1xf32>
    %2 = tpu.concatenate %1, %0, %1 in 2 : vector<4x16x1xf32>, vector<4x16x16xf32>, vector<4x16x1xf32> -> vector<4x16x18xf32>
    %3 = vector.extract_strided_slice %2 {offsets = [0, 0, 0], sizes = [4, 16, 16], strides = [1, 1, 1]} : vector<4x16x18xf32> to vector<4x16x16xf32>
    %4 = vector.extract_strided_slice %2 {offsets = [0, 0, 1], sizes = [4, 16, 16], strides = [1, 1, 1]} : vector<4x16x18xf32> to vector<4x16x16xf32>
    %5 = arith.maximumf %3, %4 : vector<4x16x16xf32>
    %6 = vector.extract_strided_slice %2 {offsets = [0, 0, 2], sizes = [4, 16, 16], strides = [1, 1, 1]} : vector<4x16x18xf32> to vector<4x16x16xf32>
    %7 = arith.maximumf %5, %6 : vector<4x16x16xf32>
    %cst_2 = arith.constant 0.000000e+00 : f32
    %8 = vector.broadcast %cst_2 : f32 to vector<4x1x16xf32>
    %9 = tpu.concatenate %8, %7, %8 in 1 : vector<4x1x16xf32>, vector<4x16x16xf32>, vector<4x1x16xf32> -> vector<4x18x16xf32>
    %10 = vector.extract_strided_slice %9 {offsets = [0, 0, 0], sizes = [4, 16, 16], strides = [1, 1, 1]} : vector<4x18x16xf32> to vector<4x16x16xf32>
    %11 = vector.extract_strided_slice %9 {offsets = [0, 1, 0], sizes = [4, 16, 16], strides = [1, 1, 1]} : vector<4x18x16xf32> to vector<4x16x16xf32>
    %12 = arith.maximumf %10, %11 : vector<4x16x16xf32>
    %13 = vector.extract_strided_slice %9 {offsets = [0, 2, 0], sizes = [4, 16, 16], strides = [1, 1, 1]} : vector<4x18x16xf32> to vector<4x16x16xf32>
    %14 = arith.maximumf %12, %13 : vector<4x16x16xf32>
    %c0_3 = arith.constant 0 : index
    %c0_4 = arith.constant 0 : index
    %c0_5 = arith.constant 0 : index
    %15 = vector.load %arg2[%c0_3, %c0_4, %c0_5] : memref<4x16x16xf32, #tpu.memory_space<vmem>>, vector<4x16x16xf32>
    tpu.vector_store %arg2[%c0_3, %c0_4, %c0_5], %14 {strides = array<i32>} : memref<4x16x16xf32, #tpu.memory_space<vmem>>, vector<4x16x16xf32>,
    return
  }
  func.func @transform_0(%arg0: i32) -> (i32, i32, i32) {
    %c0_i32 = arith.constant 0 : i32
    %c0_i32_0 = arith.constant 0 : i32
    %c0_i32_1 = arith.constant 0 : i32
    return %arg0, %c0_i32, %c0_i32_0 : i32, i32, i32
  }
  func.func @transform_1(%arg0: i32) -> (i32, i32, i32) {
    %c0_i32 = arith.constant 0 : i32
    %c0_i32_0 = arith.constant 0 : i32
    %c0_i32_1 = arith.constant 0 : i32
    return %arg0, %c0_i32, %c0_i32_0 : i32, i32, i32
  }
}

module attributes {stable_mosaic.version = 11 : i64} {
  func.func @_resize_image_kernel(%arg0: i32, %arg1: memref<2x16x16xf32, #tpu.memory_space<vmem>>, %arg2: memref<16x256xf32, #tpu.memory_space<vmem>>, %arg3: memref<256x16xf32, #tpu.memory_space<vmem>>, %arg4: memref<2x256x256xbf16, #tpu.memory_space<vmem>>) attributes {dimension_semantics = [#tpu.dimension_semantics<parallel>], iteration_bounds = array<i64: 1>, scalar_prefetch = 0 : i64, scratch_operands = 0 : i64, tpu.core_type = #tpu.core_type<tc>, window_params = [{transform_indices = @transform_0, window_bounds = array<i64: 2, 16, 16>}, {pipeline_mode = #tpu.pipeline_mode<synchronous>, transform_indices = @transform_1, window_bounds = array<i64: 16, 256>}, {pipeline_mode = #tpu.pipeline_mode<synchronous>, transform_indices = @transform_2, window_bounds = array<i64: 256, 16>}, {transform_indices = @transform_3, window_bounds = array<i64: 2, 256, 256>}]} {
    %c0 = arith.constant 0 : index
    %c0_0 = arith.constant 0 : index
    %c0_1 = arith.constant 0 : index
    %0 = vector.load %arg1[%c0, %c0_0, %c0_1] : memref<2x16x16xf32, #tpu.memory_space<vmem>>, vector<2x16x16xf32>
    %1 = vector.shape_cast %0 : vector<2x16x16xf32> to vector<32x16xf32>
    %c0_2 = arith.constant 0 : index
    %c0_3 = arith.constant 0 : index
    %2 = vector.load %arg2[%c0_2, %c0_3] : memref<16x256xf32, #tpu.memory_space<vmem>>, vector<16x256xf32>
    %cst = arith.constant dense<0.000000e+00> : vector<32x256xf32>
    %3 = tpu.matmul %1, %2, %cst {dimension_numbers = #tpu.dot_dimension_numbers<[1], [0], [0], [1], [0, 0, 1, 1], [], []>} : vector<32x16xf32>, vector<16x256xf32>, vector<32x256xf32> -> vector<32x256xf32>
    %4 = vector.shape_cast %3 : vector<32x256xf32> to vector<2x16x256xf32>
    %c0_4 = arith.constant 0 : index
    %c0_5 = arith.constant 0 : index
    %5 = vector.load %arg3[%c0_4, %c0_5] : memref<256x16xf32, #tpu.memory_space<vmem>>, vector<256x16xf32>
    %6 = vector.extract_strided_slice %4 {offsets = [0, 0, 0], sizes = [1, 16, 256], strides = [1, 1, 1]} : vector<2x16x256xf32> to vector<1x16x256xf32>
    %7 = vector.shape_cast %6 : vector<1x16x256xf32> to vector<16x256xf32>
    %cst_6 = arith.constant dense<0.000000e+00> : vector<256x256xf32>
    %8 = tpu.matmul %5, %7, %cst_6 {dimension_numbers = #tpu.dot_dimension_numbers<[1], [0], [0], [1], [0, 0, 1, 1], [], []>} : vector<256x16xf32>, vector<16x256xf32>, vector<256x256xf32> -> vector<256x256xf32>
    %9 = arith.truncf %8 : vector<256x256xf32> to vector<256x256xbf16>
    %c0_7 = arith.constant 0 : index
    %c0_8 = arith.constant 0 : index
    %c0_9 = arith.constant 0 : index
    %10 = vector.load %arg4[%c0_7, %c0_8, %c0_9] : memref<2x256x256xbf16, #tpu.memory_space<vmem>>, vector<1x256x256xbf16>
    %11 = vector.shape_cast %10 : vector<1x256x256xbf16> to vector<256x256xbf16>
    %12 = vector.shape_cast %9 : vector<256x256xbf16> to vector<1x256x256xbf16>
    tpu.vector_store %arg4[%c0_7, %c0_8, %c0_9], %12 {strides = array<i32>} : memref<2x256x256xbf16, #tpu.memory_space<vmem>>, vector<1x256x256xbf16>,
    %13 = vector.extract_strided_slice %4 {offsets = [1, 0, 0], sizes = [1, 16, 256], strides = [1, 1, 1]} : vector<2x16x256xf32> to vector<1x16x256xf32>
    %14 = vector.shape_cast %13 : vector<1x16x256xf32> to vector<16x256xf32>
    %cst_10 = arith.constant dense<0.000000e+00> : vector<256x256xf32>
    %15 = tpu.matmul %5, %14, %cst_10 {dimension_numbers = #tpu.dot_dimension_numbers<[1], [0], [0], [1], [0, 0, 1, 1], [], []>} : vector<256x16xf32>, vector<16x256xf32>, vector<256x256xf32> -> vector<256x256xf32>
    %16 = arith.truncf %15 : vector<256x256xf32> to vector<256x256xbf16>
    %c1 = arith.constant 1 : index
    %c0_11 = arith.constant 0 : index
    %c0_12 = arith.constant 0 : index
    %17 = vector.load %arg4[%c1, %c0_11, %c0_12] : memref<2x256x256xbf16, #tpu.memory_space<vmem>>, vector<1x256x256xbf16>
    %18 = vector.shape_cast %17 : vector<1x256x256xbf16> to vector<256x256xbf16>
    %19 = vector.shape_cast %16 : vector<256x256xbf16> to vector<1x256x256xbf16>
    tpu.vector_store %arg4[%c1, %c0_11, %c0_12], %19 {strides = array<i32>} : memref<2x256x256xbf16, #tpu.memory_space<vmem>>, vector<1x256x256xbf16>,
    return
  }
  func.func @transform_0(%arg0: i32) -> (i32, i32, i32) {
    %c0_i32 = arith.constant 0 : i32
    %c0_i32_0 = arith.constant 0 : i32
    %c0_i32_1 = arith.constant 0 : i32
    return %arg0, %c0_i32, %c0_i32_0 : i32, i32, i32
  }
  func.func @transform_1(%arg0: i32) -> (i32, i32) {
    %c0_i32 = arith.constant 0 : i32
    %c0_i32_0 = arith.constant 0 : i32
    %c0_i32_1 = arith.constant 0 : i32
    return %c0_i32, %c0_i32_0 : i32, i32
  }
  func.func @transform_2(%arg0: i32) -> (i32, i32) {
    %c0_i32 = arith.constant 0 : i32
    %c0_i32_0 = arith.constant 0 : i32
    %c0_i32_1 = arith.constant 0 : i32
    return %c0_i32, %c0_i32_0 : i32, i32
  }
  func.func @transform_3(%arg0: i32) -> (i32, i32, i32) {
    %c0_i32 = arith.constant 0 : i32
    %c0_i32_0 = arith.constant 0 : i32
    %c0_i32_1 = arith.constant 0 : i32
    return %arg0, %c0_i32, %c0_i32_0 : i32, i32, i32
  }
}

module attributes {stable_mosaic.version = 11 : i64} {
  func.func @_patch_embed_kernel(%arg0: i32, %arg1: memref<512x256xbf16, #tpu.memory_space<vmem>>, %arg2: memref<256x256xbf16, #tpu.memory_space<vmem>>, %arg3: memref<1x256xf32, #tpu.memory_space<vmem>>, %arg4: memref<512x256xbf16, #tpu.memory_space<vmem>>) attributes {dimension_semantics = [#tpu.dimension_semantics<parallel>], iteration_bounds = array<i64: 1>, scalar_prefetch = 0 : i64, scratch_operands = 0 : i64, tpu.core_type = #tpu.core_type<tc>, window_params = [{transform_indices = @transform_0, window_bounds = array<i64: 512, 256>}, {pipeline_mode = #tpu.pipeline_mode<synchronous>, transform_indices = @transform_1, window_bounds = array<i64: 256, 256>}, {pipeline_mode = #tpu.pipeline_mode<synchronous>, transform_indices = @transform_2, window_bounds = array<i64: 1, 256>}, {transform_indices = @transform_3, window_bounds = array<i64: 512, 256>}]} {
    %c0 = arith.constant 0 : index
    %c0_0 = arith.constant 0 : index
    %0 = vector.load %arg1[%c0, %c0_0] : memref<512x256xbf16, #tpu.memory_space<vmem>>, vector<512x256xbf16>
    %c0_1 = arith.constant 0 : index
    %c0_2 = arith.constant 0 : index
    %1 = vector.load %arg2[%c0_1, %c0_2] : memref<256x256xbf16, #tpu.memory_space<vmem>>, vector<256x256xbf16>
    %cst = arith.constant dense<0.000000e+00> : vector<512x256xf32>
    %2 = tpu.matmul %0, %1, %cst {dimension_numbers = #tpu.dot_dimension_numbers<[1], [0], [0], [1], [0, 0, 1, 1], [], []>} : vector<512x256xbf16>, vector<256x256xbf16>, vector<512x256xf32> -> vector<512x256xf32>
    %c0_3 = arith.constant 0 : index
    %c0_4 = arith.constant 0 : index
    %3 = vector.load %arg3[%c0_3, %c0_4] : memref<1x256xf32, #tpu.memory_space<vmem>>, vector<1x256xf32>
    %4 = vector.broadcast %3 : vector<1x256xf32> to vector<512x256xf32>
    %5 = arith.addf %2, %4 : vector<512x256xf32>
    %6 = arith.truncf %5 : vector<512x256xf32> to vector<512x256xbf16>
    %c0_5 = arith.constant 0 : index
    %c0_6 = arith.constant 0 : index
    %7 = vector.load %arg4[%c0_5, %c0_6] : memref<512x256xbf16, #tpu.memory_space<vmem>>, vector<512x256xbf16>
    tpu.vector_store %arg4[%c0_5, %c0_6], %6 {strides = array<i32>} : memref<512x256xbf16, #tpu.memory_space<vmem>>, vector<512x256xbf16>,
    return
  }
  func.func @transform_0(%arg0: i32) -> (i32, i32) {
    %c0_i32 = arith.constant 0 : i32
    %c0_i32_0 = arith.constant 0 : i32
    return %arg0, %c0_i32 : i32, i32
  }
  func.func @transform_1(%arg0: i32) -> (i32, i32) {
    %c0_i32 = arith.constant 0 : i32
    %c0_i32_0 = arith.constant 0 : i32
    %c0_i32_1 = arith.constant 0 : i32
    return %c0_i32, %c0_i32_0 : i32, i32
  }
  func.func @transform_2(%arg0: i32) -> (i32, i32) {
    %c0_i32 = arith.constant 0 : i32
    %c0_i32_0 = arith.constant 0 : i32
    %c0_i32_1 = arith.constant 0 : i32
    return %c0_i32, %c0_i32_0 : i32, i32
  }
  func.func @transform_3(%arg0: i32) -> (i32, i32) {
    %c0_i32 = arith.constant 0 : i32
    %c0_i32_0 = arith.constant 0 : i32
    return %arg0, %c0_i32 : i32, i32
  }
}

module attributes {stable_mosaic.version = 11 : i64} {
  func.func @_point_score_kernel(%arg0: i32, %arg1: memref<1x2x256xbf16, #tpu.memory_space<vmem>>, %arg2: memref<1x256x256xbf16, #tpu.memory_space<vmem>>, %arg3: memref<1x2x256xf32, #tpu.memory_space<vmem>>) attributes {dimension_semantics = [#tpu.dimension_semantics<parallel>], iteration_bounds = array<i64: 2>, scalar_prefetch = 0 : i64, scratch_operands = 0 : i64, tpu.core_type = #tpu.core_type<tc>, window_params = [{transform_indices = @transform_0, window_bounds = array<i64: 1, 2, 256>}, {transform_indices = @transform_1, window_bounds = array<i64: 1, 256, 256>}, {transform_indices = @transform_2, window_bounds = array<i64: 1, 2, 256>}]} {
    %c0 = arith.constant 0 : index
    %c0_0 = arith.constant 0 : index
    %c0_1 = arith.constant 0 : index
    %0 = vector.load %arg1[%c0, %c0_0, %c0_1] : memref<1x2x256xbf16, #tpu.memory_space<vmem>>, vector<1x2x256xbf16>
    %1 = vector.shape_cast %0 : vector<1x2x256xbf16> to vector<2x256xbf16>
    %c0_2 = arith.constant 0 : index
    %c0_3 = arith.constant 0 : index
    %c0_4 = arith.constant 0 : index
    %2 = vector.load %arg2[%c0_2, %c0_3, %c0_4] : memref<1x256x256xbf16, #tpu.memory_space<vmem>>, vector<1x256x256xbf16>
    %3 = vector.shape_cast %2 : vector<1x256x256xbf16> to vector<256x256xbf16>
    %cst = arith.constant dense<0.000000e+00> : vector<2x256xf32>
    %4 = tpu.matmul %1, %3, %cst {dimension_numbers = #tpu.dot_dimension_numbers<[1], [1], [0], [0], [0, 0, 1, 0], [], []>} : vector<2x256xbf16>, vector<256x256xbf16>, vector<2x256xf32> -> vector<2x256xf32>
    %c0_5 = arith.constant 0 : index
    %c0_6 = arith.constant 0 : index
    %c0_7 = arith.constant 0 : index
    %5 = vector.load %arg3[%c0_5, %c0_6, %c0_7] : memref<1x2x256xf32, #tpu.memory_space<vmem>>, vector<1x2x256xf32>
    %6 = vector.shape_cast %5 : vector<1x2x256xf32> to vector<2x256xf32>
    %7 = vector.shape_cast %4 : vector<2x256xf32> to vector<1x2x256xf32>
    tpu.vector_store %arg3[%c0_5, %c0_6, %c0_7], %7 {strides = array<i32>} : memref<1x2x256xf32, #tpu.memory_space<vmem>>, vector<1x2x256xf32>,
    return
  }
  func.func @transform_0(%arg0: i32) -> (i32, i32, i32) {
    %c0_i32 = arith.constant 0 : i32
    %c0_i32_0 = arith.constant 0 : i32
    %c0_i32_1 = arith.constant 0 : i32
    return %arg0, %c0_i32, %c0_i32_0 : i32, i32, i32
  }
  func.func @transform_1(%arg0: i32) -> (i32, i32, i32) {
    %c0_i32 = arith.constant 0 : i32
    %c0_i32_0 = arith.constant 0 : i32
    %c0_i32_1 = arith.constant 0 : i32
    return %arg0, %c0_i32, %c0_i32_0 : i32, i32, i32
  }
  func.func @transform_2(%arg0: i32) -> (i32, i32, i32) {
    %c0_i32 = arith.constant 0 : i32
    %c0_i32_0 = arith.constant 0 : i32
    %c0_i32_1 = arith.constant 0 : i32
    return %arg0, %c0_i32, %c0_i32_0 : i32, i32, i32
  }
}

module attributes {stable_mosaic.version = 11 : i64} {
  func.func @_resize_sigmoid_gate_kernel(%arg0: i32, %arg1: memref<2x2xf32, #tpu.memory_space<smem>>, %arg2: memref<1x2x16x16xf32, #tpu.memory_space<vmem>>, %arg3: memref<16x16xf32, #tpu.memory_space<vmem>>, %arg4: memref<16x16xf32, #tpu.memory_space<vmem>>, %arg5: memref<1x2x16x16xf32, #tpu.memory_space<vmem>>) attributes {dimension_semantics = [#tpu.dimension_semantics<parallel>], iteration_bounds = array<i64: 2>, scalar_prefetch = 0 : i64, scratch_operands = 0 : i64, tpu.core_type = #tpu.core_type<tc>, window_params = [{transform_indices = @transform_0, window_bounds = array<i64: 2, 2>}, {transform_indices = @transform_1, window_bounds = array<i64: 1, 2, 16, 16>}, {pipeline_mode = #tpu.pipeline_mode<synchronous>, transform_indices = @transform_2, window_bounds = array<i64: 16, 16>}, {pipeline_mode = #tpu.pipeline_mode<synchronous>, transform_indices = @transform_3, window_bounds = array<i64: 16, 16>}, {transform_indices = @transform_4, window_bounds = array<i64: 1, 2, 16, 16>}]} {
    %c0 = arith.constant 0 : index
    %c0_0 = arith.constant 0 : index
    %0 = vector.load %arg3[%c0, %c0_0] : memref<16x16xf32, #tpu.memory_space<vmem>>, vector<16x16xf32>
    %c0_1 = arith.constant 0 : index
    %c0_2 = arith.constant 0 : index
    %1 = vector.load %arg4[%c0_1, %c0_2] : memref<16x16xf32, #tpu.memory_space<vmem>>, vector<16x16xf32>
    %c0_3 = arith.constant 0 : index
    %c0_4 = arith.constant 0 : index
    %c0_5 = arith.constant 0 : index
    %c0_6 = arith.constant 0 : index
    %2 = vector.load %arg2[%c0_3, %c0_4, %c0_5, %c0_6] : memref<1x2x16x16xf32, #tpu.memory_space<vmem>>, vector<1x1x16x16xf32>
    %3 = vector.shape_cast %2 : vector<1x1x16x16xf32> to vector<16x16xf32>
    %cst = arith.constant dense<0.000000e+00> : vector<16x16xf32>
    %4 = tpu.matmul %3, %0, %cst {dimension_numbers = #tpu.dot_dimension_numbers<[1], [0], [0], [1], [0, 0, 1, 1], [], []>} : vector<16x16xf32>, vector<16x16xf32>, vector<16x16xf32> -> vector<16x16xf32>
    %cst_7 = arith.constant dense<0.000000e+00> : vector<16x16xf32>
    %5 = tpu.matmul %1, %4, %cst_7 {dimension_numbers = #tpu.dot_dimension_numbers<[1], [0], [0], [1], [0, 0, 1, 1], [], []>} : vector<16x16xf32>, vector<16x16xf32>, vector<16x16xf32> -> vector<16x16xf32>
    %6 = arith.negf %5 : vector<16x16xf32>
    %7 = math.exp %6 : vector<16x16xf32>
    %cst_8 = arith.constant 1.000000e+00 : f32
    %8 = vector.broadcast %cst_8 : f32 to vector<16x16xf32>
    %9 = arith.addf %8, %7 : vector<16x16xf32>
    %10 = arith.divf %8, %9 : vector<16x16xf32>
    %11 = arith.index_cast %arg0 : i32 to index
    %c0_9 = arith.constant 0 : index
    %12 = memref.load %arg1[%11, %c0_9] : memref<2x2xf32, #tpu.memory_space<smem>>
    %13 = vector.broadcast %12 : f32 to vector<16x16xf32>
    %14 = arith.mulf %10, %13 : vector<16x16xf32>
    %c0_10 = arith.constant 0 : index
    %c0_11 = arith.constant 0 : index
    %c0_12 = arith.constant 0 : index
    %c0_13 = arith.constant 0 : index
    %15 = vector.load %arg5[%c0_10, %c0_11, %c0_12, %c0_13] : memref<1x2x16x16xf32, #tpu.memory_space<vmem>>, vector<1x1x16x16xf32>
    %16 = vector.shape_cast %15 : vector<1x1x16x16xf32> to vector<16x16xf32>
    %17 = vector.shape_cast %14 : vector<16x16xf32> to vector<1x1x16x16xf32>
    tpu.vector_store %arg5[%c0_10, %c0_11, %c0_12, %c0_13], %17 {strides = array<i32>} : memref<1x2x16x16xf32, #tpu.memory_space<vmem>>, vector<1x1x16x16xf32>,
    %c0_14 = arith.constant 0 : index
    %c1 = arith.constant 1 : index
    %c0_15 = arith.constant 0 : index
    %c0_16 = arith.constant 0 : index
    %18 = vector.load %arg2[%c0_14, %c1, %c0_15, %c0_16] : memref<1x2x16x16xf32, #tpu.memory_space<vmem>>, vector<1x1x16x16xf32>
    %19 = vector.shape_cast %18 : vector<1x1x16x16xf32> to vector<16x16xf32>
    %cst_17 = arith.constant dense<0.000000e+00> : vector<16x16xf32>
    %20 = tpu.matmul %19, %0, %cst_17 {dimension_numbers = #tpu.dot_dimension_numbers<[1], [0], [0], [1], [0, 0, 1, 1], [], []>} : vector<16x16xf32>, vector<16x16xf32>, vector<16x16xf32> -> vector<16x16xf32>
    %cst_18 = arith.constant dense<0.000000e+00> : vector<16x16xf32>
    %21 = tpu.matmul %1, %20, %cst_18 {dimension_numbers = #tpu.dot_dimension_numbers<[1], [0], [0], [1], [0, 0, 1, 1], [], []>} : vector<16x16xf32>, vector<16x16xf32>, vector<16x16xf32> -> vector<16x16xf32>
    %22 = arith.negf %21 : vector<16x16xf32>
    %23 = math.exp %22 : vector<16x16xf32>
    %cst_19 = arith.constant 1.000000e+00 : f32
    %24 = vector.broadcast %cst_19 : f32 to vector<16x16xf32>
    %25 = arith.addf %24, %23 : vector<16x16xf32>
    %26 = arith.divf %24, %25 : vector<16x16xf32>
    %27 = arith.index_cast %arg0 : i32 to index
    %c1_20 = arith.constant 1 : index
    %28 = memref.load %arg1[%27, %c1_20] : memref<2x2xf32, #tpu.memory_space<smem>>
    %29 = vector.broadcast %28 : f32 to vector<16x16xf32>
    %30 = arith.mulf %26, %29 : vector<16x16xf32>
    %c0_21 = arith.constant 0 : index
    %c1_22 = arith.constant 1 : index
    %c0_23 = arith.constant 0 : index
    %c0_24 = arith.constant 0 : index
    %31 = vector.load %arg5[%c0_21, %c1_22, %c0_23, %c0_24] : memref<1x2x16x16xf32, #tpu.memory_space<vmem>>, vector<1x1x16x16xf32>
    %32 = vector.shape_cast %31 : vector<1x1x16x16xf32> to vector<16x16xf32>
    %33 = vector.shape_cast %30 : vector<16x16xf32> to vector<1x1x16x16xf32>
    tpu.vector_store %arg5[%c0_21, %c1_22, %c0_23, %c0_24], %33 {strides = array<i32>} : memref<1x2x16x16xf32, #tpu.memory_space<vmem>>, vector<1x1x16x16xf32>,
    return
  }
  func.func @transform_0(%arg0: i32) -> (i32, i32) {
    %c0_i32 = arith.constant 0 : i32
    %c0_i32_0 = arith.constant 0 : i32
    %c0_i32_1 = arith.constant 0 : i32
    return %c0_i32, %c0_i32_0 : i32, i32
  }
  func.func @transform_1(%arg0: i32) -> (i32, i32, i32, i32) {
    %c0_i32 = arith.constant 0 : i32
    %c0_i32_0 = arith.constant 0 : i32
    %c0_i32_1 = arith.constant 0 : i32
    %c0_i32_2 = arith.constant 0 : i32
    return %arg0, %c0_i32, %c0_i32_0, %c0_i32_1 : i32, i32, i32, i32
  }
  func.func @transform_2(%arg0: i32) -> (i32, i32) {
    %c0_i32 = arith.constant 0 : i32
    %c0_i32_0 = arith.constant 0 : i32
    %c0_i32_1 = arith.constant 0 : i32
    return %c0_i32, %c0_i32_0 : i32, i32
  }
  func.func @transform_3(%arg0: i32) -> (i32, i32) {
    %c0_i32 = arith.constant 0 : i32
    %c0_i32_0 = arith.constant 0 : i32
    %c0_i32_1 = arith.constant 0 : i32
    return %c0_i32, %c0_i32_0 : i32, i32
  }
  func.func @transform_4(%arg0: i32) -> (i32, i32, i32, i32) {
    %c0_i32 = arith.constant 0 : i32
    %c0_i32_0 = arith.constant 0 : i32
    %c0_i32_1 = arith.constant 0 : i32
    %c0_i32_2 = arith.constant 0 : i32
    return %arg0, %c0_i32, %c0_i32_0, %c0_i32_1 : i32, i32, i32, i32
  }
}

</mosaic_0001>

<bundles_post_ra>
// kernel: eq.13
= control target key start
LH: loop header
LB: loop body
LE: loop exit
PB: predicated region body
PF: predicated region fallthrough
CT: control target
= control target key end

     0   :  { %2 = vsyncpa [#allocation1], 0  ;;  %s73_s6 = smov [#allocation0]   ;;  %s113_s0 = inlined_call_operand.hbm [shape: s32[2,16,16], index: 0, kind: input, shape index: {}]   ;;  %s114_s1 = inlined_call_operand.vmem [shape: s32[2,2,16,16], index: 1, kind: output, shape index: {}]  }
   0x1   :  { %s8_s7 = sshll.u32 %s73_s6, 4  ;;  %s9_s7 = int_to_ptr.vmem [resolvable:$true] %s8_s7 }
   0x2   :  { %s59_s8 = scalar_lea.vmem %s9_s7, 512  ;;  %p64_p1 = scmp.lt.s32.totalorder %s9_s7, %s9_s7 }
   0x3   :  { %p60_p0 = scmp.ne.s32.totalorder %s9_s7, %s59_s8  ;;  %p65_p2 = scmp.lt.s32.totalorder %s59_s8, %s59_s8 }
   0x5   :  { %p66_p3 = por %p65_p2, %p64_p1 }
   0x7   :  { %p67_p4 = pnand %p66_p3, %p60_p0 }
   0x9   :  { %70 = shalt.err (!%p67_p4)
}
   0xa   :  { %s74_s9 = smov 128   ;;  %s75_s10 = smov 8  }
   0xb   :  { %14 = dma.hbm_to_vmem [thread:$0]  %s113_s0, 512, %s9_s7, [#allocation1], %s74_s9, %s74_s9, %s75_s10  }
   0xc   :  { %71 = dma.done.wait [#allocation1], 512  }
   0xd   :  { %72 = vsyncadd [#allocation1], 4294966784  ;;  %v18_v0 = vld [vmem:[#allocation0] sm:$0xff]  ;;  %v21_v1 = vld [vmem:[#allocation0 + $0x10] sm:$0xff] }
   0xe   :  { %v29_v2 = vld [vmem:[#allocation0 + $0x8] sm:$0xff]  ;;  %19 = vst [vmem:[%s114_s1] sm:$0xff] %v18_v0  ;;  %41 = vst [vmem:[%s114_s1 + $0x20] sm:$0xff] %v21_v1  ;;  %v33_v3 = vld [vmem:[#allocation0 + $0x18] sm:$0xff] }
   0xf   :  { %42 = vst [vmem:[%s114_s1 + $0x10] sm:$0xff] %v18_v0  ;;  %43 = vst [vmem:[%s114_s1 + $0x30] sm:$0xff] %v21_v1 }
  0x10   :  { %44 = vst [vmem:[%s114_s1 + $0x8] sm:$0xff] %v29_v2  ;;  %46 = vst [vmem:[%s114_s1 + $0x18] sm:$0xff] %v29_v2 }
  0x11   :  { %45 = vst [vmem:[%s114_s1 + $0x28] sm:$0xff] %v33_v3  ;;  %47 = vst [vmem:[%s114_s1 + $0x38] sm:$0xff] %v33_v3 }
  0x12   :  { %40 = vsyncpa [#allocation1], 1 }

// kernel: _forward_impl.7
= control target key start
LH: loop header
LB: loop body
LE: loop exit
PB: predicated region body
PF: predicated region fallthrough
CT: control target
= control target key end

     0   :  { %s277_s10 = smov 1   ;;  %vm48_vm0 = vcmask 7168   ;;  %vm57_vm1 = vcmask 138240   ;;  %s278_s23 = smov 127   ;;  %vm146_vm2 = vcmask 1040384   ;;  %vm187_vm3 = vcmask 1046528   ;;  %s421_s0 = inlined_call_operand.vmem [shape: f32[4,16,16], index: 0, kind: input, shape index: {}]   ;;  %s422_s1 = inlined_call_operand.vmem [shape: f32[4,16,16], index: 1, kind: output, shape index: {}]  }
   0x1   :  { %v8_v0 = vld [vmem:[%s421_s0] sm:$0xff]  ;;  %v10_v1 = vld [vmem:[%s421_s0 + $0x10] sm:$0xff]  ;;  %v9_v2 = vld [vmem:[%s421_s0 + $0x8] sm:$0xff]  ;;  %vm224_vm4 = vcmask 1045504   ;;  %vm261_vm5 = vcmask 130048  }
   0x2   :  { %24 = vrot.lane.b32.xlu0 %v8_v0, %s277_s10  ;;  %28 = vrot.lane.b32.xlu1 %v10_v1, %s277_s10  ;;  %v11_v3 = vld [vmem:[%s421_s0 + $0x18] sm:$0xff]  ;;  %v12_v4 = vld [vmem:[%s421_s0 + $0x20] sm:$0xff] }
   0x3   :  { %v13_v5 = vld [vmem:[%s421_s0 + $0x28] sm:$0xff]  ;;  %v14_v6 = vld [vmem:[%s421_s0 + $0x30] sm:$0xff]  ;;  %v15_v7 = vld [vmem:[%s421_s0 + $0x38] sm:$0xff]  ;;  %s279_s0 = smov 126  }
   0x6   :  { %26 = vrot.lane.b32.xlu0 %v9_v2, %s277_s10  ;;  %30 = vrot.lane.b32.xlu1 %v11_v3, %s277_s10 }
   0xa   :  { %32 = vrot.lane.b32.xlu0 %v12_v4, %s277_s10  ;;  %34 = vrot.lane.b32.xlu1 %v13_v5, %s277_s10 }
   0xe   :  { %36 = vrot.lane.b32.xlu0 %v14_v6, %s277_s10  ;;  %38 = vrot.lane.b32.xlu1 %v15_v7, %s277_s10 }
  0x74   :  { %v25_v8 = vpop.permute.xlu0 %24  ;;  %v29_v9 = vpop.permute.xlu1 %28 }
  0x75   :  { %v49_v10 = vsel %vm48_vm0, 0.0, %v25_v8  ;;  %v51_v11 = vsel %vm48_vm0, 0.0, %v29_v9 }
  0x76   :  { %v58_v12 = vsel %vm57_vm1, %v49_v10, 0.0  ;;  %v60_v13 = vsel %vm57_vm1, %v51_v11, 0.0 }
  0x77   :  { %74 = vrot.lane.b32.xlu0 %v58_v12, %s278_s23 }
  0x78   :  { %v27_v14 = vpop.permute.xlu0 %26  ;;  %v31_v15 = vpop.permute.xlu1 %30 }
  0x79   :  { %v50_v16 = vsel %vm48_vm0, 0.0, %v27_v14  ;;  %v52_v17 = vsel %vm48_vm0, 0.0, %v31_v15 }
  0x7a   :  { %v59_v18 = vsel %vm57_vm1, %v50_v16, 0.0  ;;  %v322_v19 = vsel %vm57_vm1, %v52_v17, 0.0 }
  0x7b   :  { %78 = vrot.lane.b32.xlu0 %v60_v13, %s278_s23  ;;  %76 = vrot.lane.b32.xlu1 %v59_v18, %s278_s23 }
  0x7c   :  { %v33_v20 = vpop.permute.xlu0 %32  ;;  %v35_v21 = vpop.permute.xlu1 %34 }
  0x7d   :  { %v53_v22 = vsel %vm48_vm0, 0.0, %v33_v20  ;;  %v54_v23 = vsel %vm48_vm0, 0.0, %v35_v21 }
  0x7e   :  { %v327_v24 = vsel %vm57_vm1, %v53_v22, 0.0  ;;  %v332_v25 = vsel %vm57_vm1, %v54_v23, 0.0 }
  0x7f   :  { %80 = vrot.lane.b32.xlu1 %v322_v19, %s278_s23  ;;  %82 = vrot.lane.b32.xlu0 %v327_v24, %s278_s23 }
  0x80   :  { %v37_v26 = vpop.permute.xlu0 %36  ;;  %v39_v27 = vpop.permute.xlu1 %38 }
  0x81   :  { %v55_v28 = vsel %vm48_vm0, 0.0, %v37_v26  ;;  %v56_v29 = vsel %vm48_vm0, 0.0, %v39_v27 }
  0x82   :  { %v337_v30 = vsel %vm57_vm1, %v55_v28, 0.0  ;;  %v342_v31 = vsel %vm57_vm1, %v56_v29, 0.0 }
  0x83   :  { %84 = vrot.lane.b32.xlu1 %v332_v25, %s278_s23  ;;  %86 = vrot.lane.b32.xlu0 %v337_v30, %s278_s23 }
  0x87   :  { %88 = vrot.lane.b32.xlu1 %v342_v31, %s278_s23  ;;  %106 = vrot.lane.b32.xlu0 %v58_v12, %s279_s0 }
  0x8b   :  { %108 = vrot.lane.b32.xlu1 %v59_v18, %s279_s0  ;;  %110 = vrot.lane.b32.xlu0 %v60_v13, %s279_s0 }
  0x8f   :  { %112 = vrot.lane.b32.xlu1 %v322_v19, %s279_s0  ;;  %114 = vrot.lane.b32.xlu0 %v327_v24, %s279_s0 }
  0x93   :  { %116 = vrot.lane.b32.xlu1 %v332_v25, %s279_s0  ;;  %118 = vrot.lane.b32.xlu0 %v337_v30, %s279_s0 }
  0x97   :  { %120 = vrot.lane.b32.xlu1 %v342_v31, %s279_s0 }
  0xe9   :  { %v75_v32 = vpop.permute.xlu0 %74 }
  0xea   :  { %v98_v39 = vmax.f32 %v58_v12, %v75_v32 }
  0xed   :  { %v77_v33 = vpop.permute.xlu1 %76  ;;  %v79_v34 = vpop.permute.xlu0 %78 }
  0xee   :  { %v99_v43 = vmax.f32 %v59_v18, %v77_v33  ;;  %v100_v44 = vmax.f32 %v60_v13, %v79_v34 }
  0xf1   :  { %v81_v35 = vpop.permute.xlu1 %80  ;;  %v83_v36 = vpop.permute.xlu0 %82 }
  0xf2   :  { %v101_v51 = vmax.f32 %v322_v19, %v81_v35  ;;  %v102_v52 = vmax.f32 %v327_v24, %v83_v36 }
  0xf5   :  { %v85_v37 = vpop.permute.xlu1 %84  ;;  %v350_v38 = vpop.permute.xlu0 %86 }
  0xf6   :  { %v103_v53 = vmax.f32 %v332_v25, %v85_v37  ;;  %v104_v56 = vmax.f32 %v337_v30, %v350_v38 }
  0xf9   :  { %v352_v40 = vpop.permute.xlu1 %88  ;;  %v107_v41 = vpop.permute.xlu0 %106 }
  0xfa   :  { %v130_v42 = vmax.f32 %v98_v39, %v107_v41  ;;  %v105_v57 = vmax.f32 %v342_v31, %v352_v40 }
  0xfc   :  { %v147_v45 = vrot.slane %v130_v42, 7 }
  0xfd   :  { %v109_v46 = vpop.permute.xlu1 %108  ;;  %v111_v47 = vpop.permute.xlu0 %110 }
  0xfe   :  { %v171_v48 = vsel %vm146_vm2, 0.0, %v147_v45  ;;  %v131_v49 = vmax.f32 %v99_v43, %v109_v46  ;;  %v132_v50 = vmax.f32 %v100_v44, %v111_v47 }
  0xff   :  { %v188_v58 = vrot.slane %v171_v48, 1  ;;  %v225_v59 = vrot.slane %v171_v48, 2 }
 0x100   :  { %v148_v54 = vrot.slane %v131_v49, 7  ;;  %v150_v55 = vrot.slane %v132_v50, 7 }
 0x101   :  { %v113_v60 = vpop.permute.xlu1 %112  ;;  %v115_v61 = vpop.permute.xlu0 %114 }
 0x102   :  { %v149_v62 = vsel %vm146_vm2, %v147_v45, %v148_v54  ;;  %v175_v63 = vsel %vm146_vm2, %v148_v54, 0.0  ;;  %v172_v0 = vsel %vm146_vm2, 0.0, %v150_v55  ;;  %v133_v1 = vmax.f32 %v101_v51, %v113_v60 }
 0x103   :  { %v189_v2 = vrot.slane %v149_v62, 1  ;;  %v191_v3 = vrot.slane %v175_v63, 1  ;;  %v226_v4 = vrot.slane %v149_v62, 2  ;;  %v228_v5 = vrot.slane %v175_v63, 2 }
 0x104   :  { %v193_v6 = vrot.slane %v172_v0, 1  ;;  %v230_v7 = vrot.slane %v172_v0, 2  ;;  %v151_v8 = vrot.slane %v133_v1, 7  ;;  %v134_v9 = vmax.f32 %v102_v52, %v115_v61 }
 0x105   :  { %v190_v10 = vsel %vm187_vm3, %v188_v58, %v189_v2  ;;  %v192_v11 = vsel %vm187_vm3, %v189_v2, %v191_v3  ;;  %v227_v12 = vsel %vm224_vm4, %v225_v59, %v226_v4  ;;  %v229_v13 = vsel %vm224_vm4, %v226_v4, %v228_v5  ;;  %v117_v14 = vpop.permute.xlu1 %116  ;;  %v119_v27 = vpop.permute.xlu0 %118 }
 0x106   :  { %v216_v15 = vmax.f32 %v171_v48, %v190_v10  ;;  %v217_v16 = vmax.f32 %v149_v62, %v192_v11  ;;  %v152_v17 = vsel %vm146_vm2, %v150_v55, %v151_v8  ;;  %v176_v18 = vsel %vm146_vm2, %v151_v8, 0.0 }
 0x107   :  { %v194_v19 = vrot.slane %v152_v17, 1  ;;  %v196_v20 = vrot.slane %v176_v18, 1  ;;  %v231_v21 = vrot.slane %v152_v17, 2  ;;  %v233_v22 = vrot.slane %v176_v18, 2 }
 0x108   :  { %v253_v23 = vmax.f32 %v216_v15, %v227_v12  ;;  %v254_v24 = vmax.f32 %v217_v16, %v229_v13  ;;  %v153_v25 = vrot.slane %v134_v9, 7  ;;  %v135_v26 = vmax.f32 %v103_v53, %v117_v14 }
 0x109   :  { %v195_v28 = vsel %vm187_vm3, %v193_v6, %v194_v19  ;;  %v197_v29 = vsel %vm187_vm3, %v194_v19, %v196_v20  ;;  %v232_v30 = vsel %vm224_vm4, %v230_v7, %v231_v21  ;;  %v234_v31 = vsel %vm224_vm4, %v231_v21, %v233_v22  ;;  %v121_v32 = vpop.permute.xlu1 %120 }
 0x10a   :  { %262 = vst.msk [vmem:[%s422_s1] sm:$0xff] %vm261_vm5, %v253_v23  ;;  %263 = vst.msk [vmem:[%s422_s1 + $0x8] sm:$0xff] %vm261_vm5, %v254_v24  ;;  %v218_v33 = vmax.f32 %v172_v0, %v195_v28  ;;  %v219_v34 = vmax.f32 %v152_v17, %v197_v29  ;;  %v173_v35 = vsel %vm146_vm2, 0.0, %v153_v25  ;;  %v154_v36 = vrot.slane %v135_v26, 7 }
 0x10b   :  { %v198_v37 = vrot.slane %v173_v35, 1  ;;  %v235_v38 = vrot.slane %v173_v35, 2  ;;  %v136_v39 = vmax.f32 %v104_v56, %v119_v27  ;;  %v137_v40 = vmax.f32 %v105_v57, %v121_v32 }
 0x10c   :  { %v255_v41 = vmax.f32 %v218_v33, %v232_v30  ;;  %v256_v42 = vmax.f32 %v219_v34, %v234_v31  ;;  %v155_v43 = vsel %vm146_vm2, %v153_v25, %v154_v36  ;;  %v177_v44 = vsel %vm146_vm2, %v154_v36, 0.0 }
 0x10d   :  { %v199_v45 = vrot.slane %v155_v43, 1  ;;  %v201_v46 = vrot.slane %v177_v44, 1  ;;  %v236_v47 = vrot.slane %v155_v43, 2  ;;  %v238_v48 = vrot.slane %v177_v44, 2 }
 0x10e   :  { %264 = vst.msk [vmem:[%s422_s1 + $0x10] sm:$0xff] %vm261_vm5, %v255_v41  ;;  %265 = vst.msk [vmem:[%s422_s1 + $0x18] sm:$0xff] %vm261_vm5, %v256_v42  ;;  %v156_v49 = vrot.slane %v136_v39, 7  ;;  %v157_v50 = vrot.slane %v137_v40, 7 }
 0x10f   :  { %v200_v51 = vsel %vm187_vm3, %v198_v37, %v199_v45  ;;  %v202_v52 = vsel %vm187_vm3, %v199_v45, %v201_v46  ;;  %v237_v53 = vsel %vm224_vm4, %v235_v38, %v236_v47  ;;  %v239_v58 = vsel %vm224_vm4, %v236_v47, %v238_v48 }
 0x110   :  { %v220_v54 = vmax.f32 %v173_v35, %v200_v51  ;;  %v221_v55 = vmax.f32 %v155_v43, %v202_v52  ;;  %v174_v56 = vsel %vm146_vm2, 0.0, %v156_v49  ;;  %v158_v57 = vsel %vm146_vm2, %v156_v49, %v157_v50 }
 0x111   :  { %v203_v59 = vrot.slane %v174_v56, 1  ;;  %v178_v60 = vsel %vm146_vm2, %v157_v50, 0.0  ;;  %v204_v61 = vrot.slane %v158_v57, 1  ;;  %v241_v1 = vrot.slane %v158_v57, 2 }
 0x112   :  { %v257_v62 = vmax.f32 %v220_v54, %v237_v53  ;;  %v258_v63 = vmax.f32 %v221_v55, %v239_v58  ;;  %v206_v0 = vrot.slane %v178_v60, 1  ;;  %v240_v2 = vrot.slane %v174_v56, 2 }
 0x113   :  { %v205_v3 = vsel %vm187_vm3, %v203_v59, %v204_v61  ;;  %v243_v4 = vrot.slane %v178_v60, 2 }
 0x114   :  { %266 = vst.msk [vmem:[%s422_s1 + $0x20] sm:$0xff] %vm261_vm5, %v257_v62  ;;  %267 = vst.msk [vmem:[%s422_s1 + $0x28] sm:$0xff] %vm261_vm5, %v258_v63  ;;  %v207_v5 = vsel %vm187_vm3, %v204_v61, %v206_v0  ;;  %v222_v6 = vmax.f32 %v174_v56, %v205_v3  ;;  %v242_v8 = vsel %vm224_vm4, %v240_v2, %v241_v1 }
 0x115   :  { %v223_v7 = vmax.f32 %v158_v57, %v207_v5  ;;  %v244_v9 = vsel %vm224_vm4, %v241_v1, %v243_v4 }
 0x116   :  { %v259_v10 = vmax.f32 %v222_v6, %v242_v8 }
 0x117   :  { %v260_v11 = vmax.f32 %v223_v7, %v244_v9 }
 0x118   :  { %268 = vst.msk [vmem:[%s422_s1 + $0x30] sm:$0xff] %vm261_vm5, %v259_v10 }
 0x119   :  { %269 = vst.msk [vmem:[%s422_s1 + $0x38] sm:$0xff] %vm261_vm5, %v260_v11 }

// kernel: _forward_impl.5
= control target key start
LH: loop header
LB: loop body
LE: loop exit
PB: predicated region body
PF: predicated region fallthrough
CT: control target
= control target key end

     0   :  { %8 = vsyncpa [#allocation3], 0  ;;  %s1931_s0 = inlined_call_operand.hbm [shape: f32[2,16,16], index: 0, kind: input, shape index: {}]   ;;  %s1932_s1 = inlined_call_operand.hbm [shape: f32[16,256], index: 1, kind: input, shape index: {}]   ;;  %s1933_s2 = inlined_call_operand.hbm [shape: f32[256,16], index: 2, kind: input, shape index: {}]   ;;  %s1934_s3 = inlined_call_operand.vmem [shape: bf16[2,256,256], index: 3, kind: output, shape index: {}]  }
   0x1   :  { %9 = vsyncpa [#allocation5], 0  ;;  %s1566_s12 = smov [#allocation4]  }
   0x2   :  { %s27_s13 = sshll.u32 %s1566_s12, 4  ;;  %s28_s13 = int_to_ptr.vmem [resolvable:$true] %s27_s13 }
   0x3   :  { %s1510_s14 = scalar_lea.vmem %s28_s13, 512  ;;  %p1515_p1 = scmp.lt.s32.totalorder %s28_s13, %s28_s13 }
   0x4   :  { %p1511_p0 = scmp.ne.s32.totalorder %s28_s13, %s1510_s14  ;;  %p1516_p2 = scmp.lt.s32.totalorder %s1510_s14, %s1510_s14 }
   0x6   :  { %p1517_p3 = por %p1516_p2, %p1515_p1 }
   0x8   :  { %p1518_p4 = pnand %p1517_p3, %p1511_p0 }
   0xa   :  { %1521 = shalt.err (!%p1518_p4)
}
   0xb   :  { %s1567_s15 = smov 256   ;;  %s1568_s16 = smov 16  }
   0xc   :  { %33 = dma.hbm_to_vmem [thread:$0]  %s1932_s1, 512, %s28_s13, [#allocation5], %s1567_s15, %s1567_s15, %s1568_s16  }
   0xd   :  { %s1569_s19 = smov [#allocation2]  }
   0xe   :  { %s15_s20 = sshll.u32 %s1569_s19, 4  ;;  %s16_s20 = int_to_ptr.vmem [resolvable:$true] %s15_s20 }
   0xf   :  { %s1530_s21 = scalar_lea.vmem %s16_s20, 512  ;;  %p1535_p6 = scmp.lt.s32.totalorder %s16_s20, %s16_s20 }
  0x10   :  { %p1531_p5 = scmp.ne.s32.totalorder %s16_s20, %s1530_s21  ;;  %p1536_p7 = scmp.lt.s32.totalorder %s1530_s21, %s1530_s21 }
  0x12   :  { %p1537_p8 = por %p1536_p7, %p1535_p6 }
  0x14   :  { %p1538_p9 = pnand %p1537_p8, %p1531_p5 }
  0x16   :  { %1541 = shalt.err (!%p1538_p9)
}
  0x17   :  { %s1570_s22 = smov 128   ;;  %s1571_s23 = smov 8  }
  0x18   :  { %21 = dma.hbm_to_vmem [thread:$0]  %s1931_s0, 512, %s16_s20, [#allocation3], %s1570_s22, %s1570_s22, %s1571_s23  }
  0x19   :  { %s1572_s26 = smov [#allocation6]  }
  0x1a   :  { %s39_s27 = sshll.u32 %s1572_s26, 4  ;;  %s40_s27 = int_to_ptr.vmem [resolvable:$true] %s39_s27 }
  0x1b   :  { %s1550_s1 = scalar_lea.vmem %s40_s27, 4096  ;;  %p1555_p11 = scmp.lt.s32.totalorder %s40_s27, %s40_s27 }
  0x1c   :  { %p1551_p10 = scmp.ne.s32.totalorder %s40_s27, %s1550_s1  ;;  %p1556_p12 = scmp.lt.s32.totalorder %s1550_s1, %s1550_s1 }
  0x1e   :  { %p1557_p13 = por %p1556_p12, %p1555_p11 }
  0x20   :  { %p1558_p0 = pnand %p1557_p13, %p1551_p10 }
  0x22   :  { %1561 = shalt.err (!%p1558_p0)
}
  0x23   :  { %45 = dma.hbm_to_vmem [thread:$0]  %s1933_s2, 4096, %s40_s27, [#allocation5], %s1570_s22, %s1570_s22, %s1571_s23  }
  0x24   :  { %1562 = dma.done.wait [#allocation3], 512  }
  0x25   :  { %1563 = vsyncadd [#allocation3], 4294966784 }
  0x26   :  { %1564 = dma.done.wait [#allocation5], 4608  }
  0x27   :  { %1565 = vsyncadd [#allocation5], 4294962688  ;;  %v1573_v0 = vmov 0.0   ;;  %v62_v1 = vld [vmem:[#allocation4 + $0x18] sm:$0xff]  ;;  %v61_v2 = vld [vmem:[#allocation4 + $0x10] sm:$0xff]  ;;  %vm63_vm0 = vcmask 130048  }
  0x28   :  { %140 = vmatprep.mubr.f32.mxu0 %v1573_v0  ;;  %152 = vmatprep.mubr.f32.mxu1 %v1573_v0  ;;  %v60_v3 = vld [vmem:[#allocation4 + $0x8] sm:$0xff]  ;;  %v59_v4 = vld [vmem:[#allocation4] sm:$0xff]  ;;  %v57_v6 = vld [vmem:[#allocation2 + $0x10] sm:$0xff] }
  0x29   :  { %104 = vmatprep.subr.mxu0 %v62_v1  ;;  %1490 = vmatprep.subr.mxu1 %v62_v1  ;;  %v55_v5 = vld [vmem:[#allocation2] sm:$0xff]  ;;  %v56_v7 = vld [vmem:[#allocation2 + $0x8] sm:$0xff]  ;;  %v58_v8 = vld [vmem:[#allocation2 + $0x18] sm:$0xff] }
  0x2a   :  { %105 = vmatpush1.msra.mxu0 %v61_v2  ;;  %1492 = vmatpush1.msra.mxu1 %v61_v2  ;;  %v165_v17 = vld [vmem:[#allocation6] sm:$0xff]  ;;  %v166_v18 = vld [vmem:[#allocation6 + $0x8] sm:$0xff]  ;;  %v167_v19 = vld [vmem:[#allocation6 + $0x10] sm:$0xff] }
  0x2b   :  { %106 = vmatprep.subr.mxu0 %v60_v3  ;;  %1491 = vmatprep.subr.mxu1 %v60_v3  ;;  %v168_v20 = vld [vmem:[#allocation6 + $0x18] sm:$0xff]  ;;  %v169_v21 = vld [vmem:[#allocation6 + $0x20] sm:$0xff]  ;;  %v170_v22 = vld [vmem:[#allocation6 + $0x28] sm:$0xff] }
  0x2c   :  { %107 = vmatpush1.msra.mxu0 %v59_v4  ;;  %1493 = vmatpush1.msra.mxu1 %v59_v4  ;;  %v171_v23 = vld [vmem:[#allocation6 + $0x30] sm:$0xff]  ;;  %v172_v24 = vld [vmem:[#allocation6 + $0x38] sm:$0xff]  ;;  %v173_v25 = vld [vmem:[#allocation6 + $0x40] sm:$0xff] }
  0x2d   :  { %1262 = vmatmul.mubr.msk.f32.vlgmr.msra.gmra.mxu0 %vm63_vm0, %v55_v5  ;;  %1264 = vmatmul.mubr.msk.f32.vlgmr.msra.gmra.mxu1 %vm63_vm0, %v57_v6  ;;  %v174_v26 = vld [vmem:[#allocation6 + $0x48] sm:$0xff]  ;;  %v175_v27 = vld [vmem:[#allocation6 + $0x50] sm:$0xff]  ;;  %v176_v28 = vld [vmem:[#allocation6 + $0x58] sm:$0xff] }
  0x2e   :  { %146 = vmatprep.mubr.f32.mxu0 %v1573_v0  ;;  %158 = vmatprep.mubr.f32.mxu1 %v1573_v0  ;;  %v177_v29 = vld [vmem:[#allocation6 + $0x60] sm:$0xff]  ;;  %v178_v30 = vld [vmem:[#allocation6 + $0x68] sm:$0xff]  ;;  %v179_v31 = vld [vmem:[#allocation6 + $0x70] sm:$0xff] }
  0x2f   :  { %v180_v32 = vld [vmem:[#allocation6 + $0x78] sm:$0xff]  ;;  %v181_v33 = vld [vmem:[#allocation6 + $0x80] sm:$0xff]  ;;  %v182_v34 = vld [vmem:[#allocation6 + $0x88] sm:$0xff] }
  0x30   :  { %v183_v35 = vld [vmem:[#allocation6 + $0x90] sm:$0xff]  ;;  %v184_v36 = vld [vmem:[#allocation6 + $0x98] sm:$0xff]  ;;  %v185_v37 = vld [vmem:[#allocation6 + $0xa0] sm:$0xff] }
  0x31   :  { %1263 = vmatmul.mubr.msk.f32.gmra.mxu0 %vm63_vm0, %v56_v7  ;;  %1265 = vmatmul.mubr.msk.f32.gmra.mxu1 %vm63_vm0, %v58_v8  ;;  %v186_v38 = vld [vmem:[#allocation6 + $0xa8] sm:$0xff]  ;;  %v187_v39 = vld [vmem:[#allocation6 + $0xb0] sm:$0xff]  ;;  %v188_v40 = vld [vmem:[#allocation6 + $0xb8] sm:$0xff] }
  0x32   :  { %357 = vmatprep.mubr.f32.mxu1 %v1573_v0  ;;  %838 = vmatprep.mubr.f32.mxu0 %v1573_v0  ;;  %v189_v41 = vld [vmem:[#allocation6 + $0xc0] sm:$0xff]  ;;  %v190_v42 = vld [vmem:[#allocation6 + $0xc8] sm:$0xff]  ;;  %v191_v43 = vld [vmem:[#allocation6 + $0xd0] sm:$0xff] }
  0x33   :  { %v192_v44 = vld [vmem:[#allocation6 + $0xd8] sm:$0xff]  ;;  %v193_v45 = vld [vmem:[#allocation6 + $0xe0] sm:$0xff]  ;;  %v194_v46 = vld [vmem:[#allocation6 + $0xe8] sm:$0xff] }
  0x34   :  { %v195_v47 = vld [vmem:[#allocation6 + $0xf0] sm:$0xff]  ;;  %v196_v48 = vld [vmem:[#allocation6 + $0xf8] sm:$0xff] }
  0xed   :  { %v142_v9 = vpop.f32.mrf.mxu0  ;;  %v154_v10 = vpop.f32.mrf.mxu1 }
  0xef   :  { %v144_v11 = vpop.f32.mrf.mxu0  ;;  %v156_v12 = vpop.f32.mrf.mxu1 }
  0xf1   :  { %v148_v13 = vpop.f32.mrf.mxu0  ;;  %v160_v14 = vpop.f32.mrf.mxu1 }
  0xf3   :  { %v150_v15 = vpop.f32.mrf.mxu0  ;;  %v162_v16 = vpop.f32.mrf.mxu1 }
  0xf4   :  { %321 = vmatprep.subr.mxu1 %v150_v15  ;;  %802 = vmatprep.subr.mxu0 %v162_v16 }
  0xf5   :  { %322 = vmatpush1.msra.mxu1 %v148_v13  ;;  %803 = vmatpush1.msra.mxu0 %v160_v14 }
  0xf6   :  { %323 = vmatprep.subr.mxu1 %v144_v11  ;;  %804 = vmatprep.subr.mxu0 %v156_v12 }
  0xf7   :  { %324 = vmatpush1.msra.mxu1 %v142_v9  ;;  %805 = vmatpush1.msra.mxu0 %v154_v10 }
  0xf8   :  { %1266 = vmatmul.mubr.msk.f32.vlgmr.msra.gmra.mxu1 %vm63_vm0, %v165_v17  ;;  %1330 = vmatmul.mubr.msk.f32.vlgmr.msra.gmra.mxu0 %vm63_vm0, %v165_v17 }
  0xf9   :  { %363 = vmatprep.mubr.f32.mxu1 %v1573_v0  ;;  %844 = vmatprep.mubr.f32.mxu0 %v1573_v0 }
  0xfc   :  { %1267 = vmatmul.mubr.msk.f32.gmra.mxu1 %vm63_vm0, %v166_v18  ;;  %1331 = vmatmul.mubr.msk.f32.gmra.mxu0 %vm63_vm0, %v166_v18 }
  0xfd   :  { %369 = vmatprep.mubr.f32.mxu1 %v1573_v0  ;;  %850 = vmatprep.mubr.f32.mxu0 %v1573_v0 }
 0x100   :  { %1268 = vmatmul.mubr.msk.f32.gmra.mxu1 %vm63_vm0, %v167_v19  ;;  %1332 = vmatmul.mubr.msk.f32.gmra.mxu0 %vm63_vm0, %v167_v19 }
 0x101   :  { %375 = vmatprep.mubr.f32.mxu1 %v1573_v0  ;;  %856 = vmatprep.mubr.f32.mxu0 %v1573_v0 }
 0x104   :  { %1269 = vmatmul.mubr.msk.f32.gmra.mxu1 %vm63_vm0, %v168_v20  ;;  %1333 = vmatmul.mubr.msk.f32.gmra.mxu0 %vm63_vm0, %v168_v20 }
 0x105   :  { %381 = vmatprep.mubr.f32.mxu1 %v1573_v0  ;;  %862 = vmatprep.mubr.f32.mxu0 %v1573_v0 }
 0x108   :  { %1270 = vmatmul.mubr.msk.f32.gmra.mxu1 %vm63_vm0, %v169_v21  ;;  %1334 = vmatmul.mubr.msk.f32.gmra.mxu0 %vm63_vm0, %v169_v21 }
 0x109   :  { %387 = vmatprep.mubr.f32.mxu1 %v1573_v0  ;;  %868 = vmatprep.mubr.f32.mxu0 %v1573_v0 }
 0x10c   :  { %1271 = vmatmul.mubr.msk.f32.gmra.mxu1 %vm63_vm0, %v170_v22  ;;  %1335 = vmatmul.mubr.msk.f32.gmra.mxu0 %vm63_vm0, %v170_v22 }
 0x10d   :  { %393 = vmatprep.mubr.f32.mxu1 %v1573_v0  ;;  %874 = vmatprep.mubr.f32.mxu0 %v1573_v0 }
 0x110   :  { %1272 = vmatmul.mubr.msk.f32.gmra.mxu1 %vm63_vm0, %v171_v23  ;;  %1336 = vmatmul.mubr.msk.f32.gmra.mxu0 %vm63_vm0, %v171_v23 }
 0x111   :  { %399 = vmatprep.mubr.f32.mxu1 %v1573_v0  ;;  %880 = vmatprep.mubr.f32.mxu0 %v1573_v0 }
 0x114   :  { %1273 = vmatmul.mubr.msk.f32.gmra.mxu1 %vm63_vm0, %v172_v24  ;;  %1337 = vmatmul.mubr.msk.f32.gmra.mxu0 %vm63_vm0, %v172_v24 }
 0x115   :  { %405 = vmatprep.mubr.f32.mxu1 %v1573_v0  ;;  %886 = vmatprep.mubr.f32.mxu0 %v1573_v0 }
 0x118   :  { %1274 = vmatmul.mubr.msk.f32.gmra.mxu1 %vm63_vm0, %v173_v25  ;;  %1338 = vmatmul.mubr.msk.f32.gmra.mxu0 %vm63_vm0, %v173_v25 }
 0x119   :  { %411 = vmatprep.mubr.f32.mxu1 %v1573_v0  ;;  %892 = vmatprep.mubr.f32.mxu0 %v1573_v0 }
 0x11c   :  { %1275 = vmatmul.mubr.msk.f32.gmra.mxu1 %vm63_vm0, %v174_v26  ;;  %1339 = vmatmul.mubr.msk.f32.gmra.mxu0 %vm63_vm0, %v174_v26 }
 0x11d   :  { %417 = vmatprep.mubr.f32.mxu1 %v1573_v0  ;;  %898 = vmatprep.mubr.f32.mxu0 %v1573_v0 }
 0x120   :  { %1276 = vmatmul.mubr.msk.f32.gmra.mxu1 %vm63_vm0, %v175_v27  ;;  %1340 = vmatmul.mubr.msk.f32.gmra.mxu0 %vm63_vm0, %v175_v27 }
 0x121   :  { %423 = vmatprep.mubr.f32.mxu1 %v1573_v0  ;;  %904 = vmatprep.mubr.f32.mxu0 %v1573_v0 }
 0x124   :  { %1277 = vmatmul.mubr.msk.f32.gmra.mxu1 %vm63_vm0, %v176_v28  ;;  %1341 = vmatmul.mubr.msk.f32.gmra.mxu0 %vm63_vm0, %v176_v28 }
 0x125   :  { %429 = vmatprep.mubr.f32.mxu1 %v1573_v0  ;;  %910 = vmatprep.mubr.f32.mxu0 %v1573_v0 }
 0x128   :  { %1278 = vmatmul.mubr.msk.f32.gmra.mxu1 %vm63_vm0, %v177_v29  ;;  %1342 = vmatmul.mubr.msk.f32.gmra.mxu0 %vm63_vm0, %v177_v29 }
 0x129   :  { %435 = vmatprep.mubr.f32.mxu1 %v1573_v0  ;;  %916 = vmatprep.mubr.f32.mxu0 %v1573_v0 }
 0x12c   :  { %1279 = vmatmul.mubr.msk.f32.gmra.mxu1 %vm63_vm0, %v178_v30  ;;  %1343 = vmatmul.mubr.msk.f32.gmra.mxu0 %vm63_vm0, %v178_v30 }
 0x12d   :  { %441 = vmatprep.mubr.f32.mxu1 %v1573_v0  ;;  %922 = vmatprep.mubr.f32.mxu0 %v1573_v0 }
 0x130   :  { %1280 = vmatmul.mubr.msk.f32.gmra.mxu1 %vm63_vm0, %v179_v31  ;;  %1344 = vmatmul.mubr.msk.f32.gmra.mxu0 %vm63_vm0, %v179_v31 }
 0x131   :  { %447 = vmatprep.mubr.f32.mxu1 %v1573_v0  ;;  %928 = vmatprep.mubr.f32.mxu0 %v1573_v0 }
 0x134   :  { %1281 = vmatmul.mubr.msk.f32.gmra.mxu1 %vm63_vm0, %v180_v32  ;;  %1345 = vmatmul.mubr.msk.f32.gmra.mxu0 %vm63_vm0, %v180_v32 }
 0x135   :  { %453 = vmatprep.mubr.f32.mxu1 %v1573_v0  ;;  %934 = vmatprep.mubr.f32.mxu0 %v1573_v0 }
 0x138   :  { %1282 = vmatmul.mubr.msk.f32.gmra.mxu1 %vm63_vm0, %v181_v33  ;;  %1346 = vmatmul.mubr.msk.f32.gmra.mxu0 %vm63_vm0, %v181_v33 }
 0x139   :  { %459 = vmatprep.mubr.f32.mxu1 %v1573_v0  ;;  %940 = vmatprep.mubr.f32.mxu0 %v1573_v0 }
 0x13c   :  { %1283 = vmatmul.mubr.msk.f32.gmra.mxu1 %vm63_vm0, %v182_v34  ;;  %1347 = vmatmul.mubr.msk.f32.gmra.mxu0 %vm63_vm0, %v182_v34 }
 0x13d   :  { %465 = vmatprep.mubr.f32.mxu1 %v1573_v0  ;;  %946 = vmatprep.mubr.f32.mxu0 %v1573_v0 }
 0x140   :  { %1284 = vmatmul.mubr.msk.f32.gmra.mxu1 %vm63_vm0, %v183_v35  ;;  %1348 = vmatmul.mubr.msk.f32.gmra.mxu0 %vm63_vm0, %v183_v35 }
 0x141   :  { %471 = vmatprep.mubr.f32.mxu1 %v1573_v0  ;;  %952 = vmatprep.mubr.f32.mxu0 %v1573_v0 }
 0x144   :  { %1285 = vmatmul.mubr.msk.f32.gmra.mxu1 %vm63_vm0, %v184_v36  ;;  %1349 = vmatmul.mubr.msk.f32.gmra.mxu0 %vm63_vm0, %v184_v36 }
 0x145   :  { %477 = vmatprep.mubr.f32.mxu1 %v1573_v0  ;;  %958 = vmatprep.mubr.f32.mxu0 %v1573_v0 }
 0x148   :  { %1286 = vmatmul.mubr.msk.f32.gmra.mxu1 %vm63_vm0, %v185_v37  ;;  %1350 = vmatmul.mubr.msk.f32.gmra.mxu0 %vm63_vm0, %v185_v37 }
 0x149   :  { %483 = vmatprep.mubr.f32.mxu1 %v1573_v0  ;;  %964 = vmatprep.mubr.f32.mxu0 %v1573_v0 }
 0x14c   :  { %1287 = vmatmul.mubr.msk.f32.gmra.mxu1 %vm63_vm0, %v186_v38  ;;  %1351 = vmatmul.mubr.msk.f32.gmra.mxu0 %vm63_vm0, %v186_v38 }
 0x14d   :  { %489 = vmatprep.mubr.f32.mxu1 %v1573_v0  ;;  %970 = vmatprep.mubr.f32.mxu0 %v1573_v0 }
 0x150   :  { %1288 = vmatmul.mubr.msk.f32.gmra.mxu1 %vm63_vm0, %v187_v39  ;;  %1352 = vmatmul.mubr.msk.f32.gmra.mxu0 %vm63_vm0, %v187_v39 }
 0x151   :  { %495 = vmatprep.mubr.f32.mxu1 %v1573_v0  ;;  %976 = vmatprep.mubr.f32.mxu0 %v1573_v0 }
 0x154   :  { %1289 = vmatmul.mubr.msk.f32.gmra.mxu1 %vm63_vm0, %v188_v40  ;;  %1353 = vmatmul.mubr.msk.f32.gmra.mxu0 %vm63_vm0, %v188_v40 }
 0x155   :  { %501 = vmatprep.mubr.f32.mxu1 %v1573_v0  ;;  %982 = vmatprep.mubr.f32.mxu0 %v1573_v0 }
 0x158   :  { %1290 = vmatmul.mubr.msk.f32.gmra.mxu1 %vm63_vm0, %v189_v41  ;;  %1354 = vmatmul.mubr.msk.f32.gmra.mxu0 %vm63_vm0, %v189_v41 }
 0x159   :  { %507 = vmatprep.mubr.f32.mxu1 %v1573_v0  ;;  %988 = vmatprep.mubr.f32.mxu0 %v1573_v0 }
 0x15c   :  { %1291 = vmatmul.mubr.msk.f32.gmra.mxu1 %vm63_vm0, %v190_v42  ;;  %1355 = vmatmul.mubr.msk.f32.gmra.mxu0 %vm63_vm0, %v190_v42 }
 0x15d   :  { %513 = vmatprep.mubr.f32.mxu1 %v1573_v0  ;;  %994 = vmatprep.mubr.f32.mxu0 %v1573_v0 }
 0x160   :  { %1292 = vmatmul.mubr.msk.f32.gmra.mxu1 %vm63_vm0, %v191_v43  ;;  %1356 = vmatmul.mubr.msk.f32.gmra.mxu0 %vm63_vm0, %v191_v43 }
 0x161   :  { %519 = vmatprep.mubr.f32.mxu1 %v1573_v0  ;;  %1000 = vmatprep.mubr.f32.mxu0 %v1573_v0 }
 0x164   :  { %1293 = vmatmul.mubr.msk.f32.gmra.mxu1 %vm63_vm0, %v192_v44  ;;  %1357 = vmatmul.mubr.msk.f32.gmra.mxu0 %vm63_vm0, %v192_v44 }
 0x165   :  { %525 = vmatprep.mubr.f32.mxu1 %v1573_v0  ;;  %1006 = vmatprep.mubr.f32.mxu0 %v1573_v0 }
 0x168   :  { %1294 = vmatmul.mubr.msk.f32.gmra.mxu1 %vm63_vm0, %v193_v45  ;;  %1358 = vmatmul.mubr.msk.f32.gmra.mxu0 %vm63_vm0, %v193_v45 }
 0x169   :  { %531 = vmatprep.mubr.f32.mxu1 %v1573_v0  ;;  %1012 = vmatprep.mubr.f32.mxu0 %v1573_v0 }
 0x16c   :  { %1295 = vmatmul.mubr.msk.f32.gmra.mxu1 %vm63_vm0, %v194_v46  ;;  %1359 = vmatmul.mubr.msk.f32.gmra.mxu0 %vm63_vm0, %v194_v46 }
 0x16d   :  { %537 = vmatprep.mubr.f32.mxu1 %v1573_v0  ;;  %1018 = vmatprep.mubr.f32.mxu0 %v1573_v0 }
 0x170   :  { %1296 = vmatmul.mubr.msk.f32.gmra.mxu1 %vm63_vm0, %v195_v47  ;;  %1360 = vmatmul.mubr.msk.f32.gmra.mxu0 %vm63_vm0, %v195_v47 }
 0x171   :  { %543 = vmatprep.mubr.f32.mxu1 %v1573_v0  ;;  %1024 = vmatprep.mubr.f32.mxu0 %v1573_v0 }
 0x174   :  { %1297 = vmatmul.mubr.msk.f32.gmra.mxu1 %vm63_vm0, %v196_v48  ;;  %1361 = vmatmul.mubr.msk.f32.gmra.mxu0 %vm63_vm0, %v196_v48 }
 0x1b8   :  { %v359_v49 = vpop.f32.mrf.mxu1  ;;  %v840_v50 = vpop.f32.mrf.mxu0 }
 0x1ba   :  { %v361_v51 = vpop.f32.mrf.mxu1  ;;  %v842_v52 = vpop.f32.mrf.mxu0 }
 0x1bb   :  { %v1426_v53 = vpack.c.bf16 %v361_v51, %v359_v49  ;;  %v1458_v54 = vpack.c.bf16 %v842_v52, %v840_v50 }
 0x1bc   :  { %v365_v55 = vpop.f32.mrf.mxu1  ;;  %v846_v56 = vpop.f32.mrf.mxu0 }
 0x1bd   :  { %742 = vst [vmem:[%s1934_s3] sm:$0xff] %v1426_v53  ;;  %1394 = vst [vmem:[%s1934_s3 + $0x100] sm:$0xff] %v1458_v54 }
 0x1be   :  { %v367_v57 = vpop.f32.mrf.mxu1  ;;  %v848_v58 = vpop.f32.mrf.mxu0 }
 0x1bf   :  { %v1427_v59 = vpack.c.bf16 %v367_v57, %v365_v55  ;;  %v1459_v60 = vpack.c.bf16 %v848_v58, %v846_v56 }
 0x1c0   :  { %v371_v61 = vpop.f32.mrf.mxu1  ;;  %v852_v62 = vpop.f32.mrf.mxu0 }
 0x1c1   :  { %743 = vst [vmem:[%s1934_s3 + $0x8] sm:$0xff] %v1427_v59  ;;  %1395 = vst [vmem:[%s1934_s3 + $0x108] sm:$0xff] %v1459_v60 }
 0x1c2   :  { %v373_v63 = vpop.f32.mrf.mxu1  ;;  %v854_v0 = vpop.f32.mrf.mxu0 }
 0x1c3   :  { %v1428_v1 = vpack.c.bf16 %v373_v63, %v371_v61  ;;  %v1460_v2 = vpack.c.bf16 %v854_v0, %v852_v62 }
 0x1c4   :  { %v377_v3 = vpop.f32.mrf.mxu1  ;;  %v858_v4 = vpop.f32.mrf.mxu0 }
 0x1c5   :  { %744 = vst [vmem:[%s1934_s3 + $0x10] sm:$0xff] %v1428_v1  ;;  %1396 = vst [vmem:[%s1934_s3 + $0x110] sm:$0xff] %v1460_v2 }
 0x1c6   :  { %v379_v5 = vpop.f32.mrf.mxu1  ;;  %v860_v6 = vpop.f32.mrf.mxu0 }
 0x1c7   :  { %v1429_v7 = vpack.c.bf16 %v379_v5, %v377_v3  ;;  %v1461_v8 = vpack.c.bf16 %v860_v6, %v858_v4 }
 0x1c8   :  { %v383_v9 = vpop.f32.mrf.mxu1  ;;  %v864_v10 = vpop.f32.mrf.mxu0 }
 0x1c9   :  { %745 = vst [vmem:[%s1934_s3 + $0x18] sm:$0xff] %v1429_v7  ;;  %1397 = vst [vmem:[%s1934_s3 + $0x118] sm:$0xff] %v1461_v8 }
 0x1ca   :  { %v385_v11 = vpop.f32.mrf.mxu1  ;;  %v866_v12 = vpop.f32.mrf.mxu0 }
 0x1cb   :  { %v1430_v13 = vpack.c.bf16 %v385_v11, %v383_v9  ;;  %v1462_v14 = vpack.c.bf16 %v866_v12, %v864_v10 }
 0x1cc   :  { %v389_v15 = vpop.f32.mrf.mxu1  ;;  %v870_v16 = vpop.f32.mrf.mxu0 }
 0x1cd   :  { %746 = vst [vmem:[%s1934_s3 + $0x20] sm:$0xff] %v1430_v13  ;;  %1398 = vst [vmem:[%s1934_s3 + $0x120] sm:$0xff] %v1462_v14 }
 0x1ce   :  { %v391_v17 = vpop.f32.mrf.mxu1  ;;  %v872_v18 = vpop.f32.mrf.mxu0 }
 0x1cf   :  { %v1431_v19 = vpack.c.bf16 %v391_v17, %v389_v15  ;;  %v1463_v20 = vpack.c.bf16 %v872_v18, %v870_v16 }
 0x1d0   :  { %v395_v21 = vpop.f32.mrf.mxu1  ;;  %v876_v22 = vpop.f32.mrf.mxu0 }
 0x1d1   :  { %747 = vst [vmem:[%s1934_s3 + $0x28] sm:$0xff] %v1431_v19  ;;  %1399 = vst [vmem:[%s1934_s3 + $0x128] sm:$0xff] %v1463_v20 }
 0x1d2   :  { %v397_v23 = vpop.f32.mrf.mxu1  ;;  %v878_v24 = vpop.f32.mrf.mxu0 }
 0x1d3   :  { %v1432_v25 = vpack.c.bf16 %v397_v23, %v395_v21  ;;  %v1464_v26 = vpack.c.bf16 %v878_v24, %v876_v22 }
 0x1d4   :  { %v401_v27 = vpop.f32.mrf.mxu1  ;;  %v882_v28 = vpop.f32.mrf.mxu0 }
 0x1d5   :  { %748 = vst [vmem:[%s1934_s3 + $0x30] sm:$0xff] %v1432_v25  ;;  %1400 = vst [vmem:[%s1934_s3 + $0x130] sm:$0xff] %v1464_v26 }
 0x1d6   :  { %v403_v29 = vpop.f32.mrf.mxu1  ;;  %v884_v30 = vpop.f32.mrf.mxu0 }
 0x1d7   :  { %v1433_v31 = vpack.c.bf16 %v403_v29, %v401_v27  ;;  %v1465_v32 = vpack.c.bf16 %v884_v30, %v882_v28 }
 0x1d8   :  { %v407_v33 = vpop.f32.mrf.mxu1  ;;  %v888_v34 = vpop.f32.mrf.mxu0 }
 0x1d9   :  { %749 = vst [vmem:[%s1934_s3 + $0x38] sm:$0xff] %v1433_v31  ;;  %1401 = vst [vmem:[%s1934_s3 + $0x138] sm:$0xff] %v1465_v32 }
 0x1da   :  { %v409_v35 = vpop.f32.mrf.mxu1  ;;  %v890_v36 = vpop.f32.mrf.mxu0 }
 0x1db   :  { %v1434_v37 = vpack.c.bf16 %v409_v35, %v407_v33  ;;  %v1466_v38 = vpack.c.bf16 %v890_v36, %v888_v34 }
 0x1dc   :  { %v413_v39 = vpop.f32.mrf.mxu1  ;;  %v894_v40 = vpop.f32.mrf.mxu0 }
 0x1dd   :  { %750 = vst [vmem:[%s1934_s3 + $0x40] sm:$0xff] %v1434_v37  ;;  %1402 = vst [vmem:[%s1934_s3 + $0x140] sm:$0xff] %v1466_v38 }
 0x1de   :  { %v415_v41 = vpop.f32.mrf.mxu1  ;;  %v896_v42 = vpop.f32.mrf.mxu0 }
 0x1df   :  { %v1435_v43 = vpack.c.bf16 %v415_v41, %v413_v39  ;;  %v1467_v44 = vpack.c.bf16 %v896_v42, %v894_v40 }
 0x1e0   :  { %v419_v45 = vpop.f32.mrf.mxu1  ;;  %v900_v46 = vpop.f32.mrf.mxu0 }
 0x1e1   :  { %751 = vst [vmem:[%s1934_s3 + $0x48] sm:$0xff] %v1435_v43  ;;  %1403 = vst [vmem:[%s1934_s3 + $0x148] sm:$0xff] %v1467_v44 }
 0x1e2   :  { %v421_v47 = vpop.f32.mrf.mxu1  ;;  %v902_v48 = vpop.f32.mrf.mxu0 }
 0x1e3   :  { %v1436_v49 = vpack.c.bf16 %v421_v47, %v419_v45  ;;  %v1468_v50 = vpack.c.bf16 %v902_v48, %v900_v46 }
 0x1e4   :  { %v425_v51 = vpop.f32.mrf.mxu1  ;;  %v906_v52 = vpop.f32.mrf.mxu0 }
 0x1e5   :  { %752 = vst [vmem:[%s1934_s3 + $0x50] sm:$0xff] %v1436_v49  ;;  %1404 = vst [vmem:[%s1934_s3 + $0x150] sm:$0xff] %v1468_v50 }
 0x1e6   :  { %v427_v53 = vpop.f32.mrf.mxu1  ;;  %v908_v54 = vpop.f32.mrf.mxu0 }
 0x1e7   :  { %v1437_v55 = vpack.c.bf16 %v427_v53, %v425_v51  ;;  %v1469_v56 = vpack.c.bf16 %v908_v54, %v906_v52 }
 0x1e8   :  { %v431_v57 = vpop.f32.mrf.mxu1  ;;  %v912_v58 = vpop.f32.mrf.mxu0 }
 0x1e9   :  { %753 = vst [vmem:[%s1934_s3 + $0x58] sm:$0xff] %v1437_v55  ;;  %1405 = vst [vmem:[%s1934_s3 + $0x158] sm:$0xff] %v1469_v56 }
 0x1ea   :  { %v433_v59 = vpop.f32.mrf.mxu1  ;;  %v914_v60 = vpop.f32.mrf.mxu0 }
 0x1eb   :  { %v1438_v61 = vpack.c.bf16 %v433_v59, %v431_v57  ;;  %v1470_v62 = vpack.c.bf16 %v914_v60, %v912_v58 }
 0x1ec   :  { %v437_v63 = vpop.f32.mrf.mxu1  ;;  %v918_v0 = vpop.f32.mrf.mxu0 }
 0x1ed   :  { %754 = vst [vmem:[%s1934_s3 + $0x60] sm:$0xff] %v1438_v61  ;;  %1406 = vst [vmem:[%s1934_s3 + $0x160] sm:$0xff] %v1470_v62 }
 0x1ee   :  { %v439_v1 = vpop.f32.mrf.mxu1  ;;  %v920_v2 = vpop.f32.mrf.mxu0 }
 0x1ef   :  { %v1439_v3 = vpack.c.bf16 %v439_v1, %v437_v63  ;;  %v1471_v4 = vpack.c.bf16 %v920_v2, %v918_v0 }
 0x1f0   :  { %v443_v5 = vpop.f32.mrf.mxu1  ;;  %v924_v6 = vpop.f32.mrf.mxu0 }
 0x1f1   :  { %755 = vst [vmem:[%s1934_s3 + $0x68] sm:$0xff] %v1439_v3  ;;  %1407 = vst [vmem:[%s1934_s3 + $0x168] sm:$0xff] %v1471_v4 }
 0x1f2   :  { %v445_v7 = vpop.f32.mrf.mxu1  ;;  %v926_v8 = vpop.f32.mrf.mxu0 }
 0x1f3   :  { %v1440_v9 = vpack.c.bf16 %v445_v7, %v443_v5  ;;  %v1472_v10 = vpack.c.bf16 %v926_v8, %v924_v6 }
 0x1f4   :  { %v449_v11 = vpop.f32.mrf.mxu1  ;;  %v930_v12 = vpop.f32.mrf.mxu0 }
 0x1f5   :  { %756 = vst [vmem:[%s1934_s3 + $0x70] sm:$0xff] %v1440_v9  ;;  %1408 = vst [vmem:[%s1934_s3 + $0x170] sm:$0xff] %v1472_v10 }
 0x1f6   :  { %v451_v13 = vpop.f32.mrf.mxu1  ;;  %v932_v14 = vpop.f32.mrf.mxu0 }
 0x1f7   :  { %v1441_v15 = vpack.c.bf16 %v451_v13, %v449_v11  ;;  %v1473_v16 = vpack.c.bf16 %v932_v14, %v930_v12 }
 0x1f8   :  { %v455_v17 = vpop.f32.mrf.mxu1  ;;  %v936_v18 = vpop.f32.mrf.mxu0 }
 0x1f9   :  { %757 = vst [vmem:[%s1934_s3 + $0x78] sm:$0xff] %v1441_v15  ;;  %1409 = vst [vmem:[%s1934_s3 + $0x178] sm:$0xff] %v1473_v16 }
 0x1fa   :  { %v457_v19 = vpop.f32.mrf.mxu1  ;;  %v938_v20 = vpop.f32.mrf.mxu0 }
 0x1fb   :  { %v1442_v21 = vpack.c.bf16 %v457_v19, %v455_v17  ;;  %v1474_v22 = vpack.c.bf16 %v938_v20, %v936_v18 }
 0x1fc   :  { %v461_v23 = vpop.f32.mrf.mxu1  ;;  %v942_v24 = vpop.f32.mrf.mxu0 }
 0x1fd   :  { %758 = vst [vmem:[%s1934_s3 + $0x80] sm:$0xff] %v1442_v21  ;;  %1410 = vst [vmem:[%s1934_s3 + $0x180] sm:$0xff] %v1474_v22 }
 0x1fe   :  { %v463_v25 = vpop.f32.mrf.mxu1  ;;  %v944_v26 = vpop.f32.mrf.mxu0 }
 0x1ff   :  { %v1443_v27 = vpack.c.bf16 %v463_v25, %v461_v23  ;;  %v1475_v28 = vpack.c.bf16 %v944_v26, %v942_v24 }
 0x200   :  { %v467_v29 = vpop.f32.mrf.mxu1  ;;  %v948_v30 = vpop.f32.mrf.mxu0 }
 0x201   :  { %759 = vst [vmem:[%s1934_s3 + $0x88] sm:$0xff] %v1443_v27  ;;  %1411 = vst [vmem:[%s1934_s3 + $0x188] sm:$0xff] %v1475_v28 }
 0x202   :  { %v469_v31 = vpop.f32.mrf.mxu1  ;;  %v950_v32 = vpop.f32.mrf.mxu0 }
 0x203   :  { %v1444_v33 = vpack.c.bf16 %v469_v31, %v467_v29  ;;  %v1476_v34 = vpack.c.bf16 %v950_v32, %v948_v30 }
 0x204   :  { %v473_v35 = vpop.f32.mrf.mxu1  ;;  %v954_v36 = vpop.f32.mrf.mxu0 }
 0x205   :  { %760 = vst [vmem:[%s1934_s3 + $0x90] sm:$0xff] %v1444_v33  ;;  %1412 = vst [vmem:[%s1934_s3 + $0x190] sm:$0xff] %v1476_v34 }
 0x206   :  { %v475_v37 = vpop.f32.mrf.mxu1  ;;  %v956_v38 = vpop.f32.mrf.mxu0 }
 0x207   :  { %v1445_v39 = vpack.c.bf16 %v475_v37, %v473_v35  ;;  %v1477_v40 = vpack.c.bf16 %v956_v38, %v954_v36 }
 0x208   :  { %v479_v41 = vpop.f32.mrf.mxu1  ;;  %v960_v42 = vpop.f32.mrf.mxu0 }
 0x209   :  { %761 = vst [vmem:[%s1934_s3 + $0x98] sm:$0xff] %v1445_v39  ;;  %1413 = vst [vmem:[%s1934_s3 + $0x198] sm:$0xff] %v1477_v40 }
 0x20a   :  { %v481_v43 = vpop.f32.mrf.mxu1  ;;  %v962_v44 = vpop.f32.mrf.mxu0 }
 0x20b   :  { %v1446_v45 = vpack.c.bf16 %v481_v43, %v479_v41  ;;  %v1478_v46 = vpack.c.bf16 %v962_v44, %v960_v42 }
 0x20c   :  { %v485_v47 = vpop.f32.mrf.mxu1  ;;  %v966_v48 = vpop.f32.mrf.mxu0 }
 0x20d   :  { %762 = vst [vmem:[%s1934_s3 + $0xa0] sm:$0xff] %v1446_v45  ;;  %1414 = vst [vmem:[%s1934_s3 + $0x1a0] sm:$0xff] %v1478_v46 }
 0x20e   :  { %v487_v49 = vpop.f32.mrf.mxu1  ;;  %v968_v50 = vpop.f32.mrf.mxu0 }
 0x20f   :  { %v1447_v51 = vpack.c.bf16 %v487_v49, %v485_v47  ;;  %v1479_v52 = vpack.c.bf16 %v968_v50, %v966_v48 }
 0x210   :  { %v491_v53 = vpop.f32.mrf.mxu1  ;;  %v972_v54 = vpop.f32.mrf.mxu0 }
 0x211   :  { %763 = vst [vmem:[%s1934_s3 + $0xa8] sm:$0xff] %v1447_v51  ;;  %1415 = vst [vmem:[%s1934_s3 + $0x1a8] sm:$0xff] %v1479_v52 }
 0x212   :  { %v493_v55 = vpop.f32.mrf.mxu1  ;;  %v974_v56 = vpop.f32.mrf.mxu0 }
 0x213   :  { %v1448_v57 = vpack.c.bf16 %v493_v55, %v491_v53  ;;  %v1480_v58 = vpack.c.bf16 %v974_v56, %v972_v54 }
 0x214   :  { %v497_v59 = vpop.f32.mrf.mxu1  ;;  %v978_v60 = vpop.f32.mrf.mxu0 }
 0x215   :  { %764 = vst [vmem:[%s1934_s3 + $0xb0] sm:$0xff] %v1448_v57  ;;  %1416 = vst [vmem:[%s1934_s3 + $0x1b0] sm:$0xff] %v1480_v58 }
 0x216   :  { %v499_v61 = vpop.f32.mrf.mxu1  ;;  %v980_v62 = vpop.f32.mrf.mxu0 }
 0x217   :  { %v1449_v63 = vpack.c.bf16 %v499_v61, %v497_v59  ;;  %v1481_v0 = vpack.c.bf16 %v980_v62, %v978_v60 }
 0x218   :  { %v503_v1 = vpop.f32.mrf.mxu1  ;;  %v984_v2 = vpop.f32.mrf.mxu0 }
 0x219   :  { %765 = vst [vmem:[%s1934_s3 + $0xb8] sm:$0xff] %v1449_v63  ;;  %1417 = vst [vmem:[%s1934_s3 + $0x1b8] sm:$0xff] %v1481_v0 }
 0x21a   :  { %v505_v3 = vpop.f32.mrf.mxu1  ;;  %v986_v4 = vpop.f32.mrf.mxu0 }
 0x21b   :  { %v1450_v5 = vpack.c.bf16 %v505_v3, %v503_v1  ;;  %v1482_v6 = vpack.c.bf16 %v986_v4, %v984_v2 }
 0x21c   :  { %v509_v7 = vpop.f32.mrf.mxu1  ;;  %v990_v8 = vpop.f32.mrf.mxu0 }
 0x21d   :  { %766 = vst [vmem:[%s1934_s3 + $0xc0] sm:$0xff] %v1450_v5  ;;  %1418 = vst [vmem:[%s1934_s3 + $0x1c0] sm:$0xff] %v1482_v6 }
 0x21e   :  { %v511_v9 = vpop.f32.mrf.mxu1  ;;  %v992_v10 = vpop.f32.mrf.mxu0 }
 0x21f   :  { %v1451_v11 = vpack.c.bf16 %v511_v9, %v509_v7  ;;  %v1483_v12 = vpack.c.bf16 %v992_v10, %v990_v8 }
 0x220   :  { %v515_v13 = vpop.f32.mrf.mxu1  ;;  %v996_v14 = vpop.f32.mrf.mxu0 }
 0x221   :  { %767 = vst [vmem:[%s1934_s3 + $0xc8] sm:$0xff] %v1451_v11  ;;  %1419 = vst [vmem:[%s1934_s3 + $0x1c8] sm:$0xff] %v1483_v12 }
 0x222   :  { %v517_v15 = vpop.f32.mrf.mxu1  ;;  %v998_v16 = vpop.f32.mrf.mxu0 }
 0x223   :  { %v1452_v17 = vpack.c.bf16 %v517_v15, %v515_v13  ;;  %v1484_v18 = vpack.c.bf16 %v998_v16, %v996_v14 }
 0x224   :  { %v521_v19 = vpop.f32.mrf.mxu1  ;;  %v1002_v20 = vpop.f32.mrf.mxu0 }
 0x225   :  { %768 = vst [vmem:[%s1934_s3 + $0xd0] sm:$0xff] %v1452_v17  ;;  %1420 = vst [vmem:[%s1934_s3 + $0x1d0] sm:$0xff] %v1484_v18 }
 0x226   :  { %v523_v21 = vpop.f32.mrf.mxu1  ;;  %v1004_v22 = vpop.f32.mrf.mxu0 }
 0x227   :  { %v1453_v23 = vpack.c.bf16 %v523_v21, %v521_v19  ;;  %v1485_v24 = vpack.c.bf16 %v1004_v22, %v1002_v20 }
 0x228   :  { %v527_v25 = vpop.f32.mrf.mxu1  ;;  %v1008_v26 = vpop.f32.mrf.mxu0 }
 0x229   :  { %769 = vst [vmem:[%s1934_s3 + $0xd8] sm:$0xff] %v1453_v23  ;;  %1421 = vst [vmem:[%s1934_s3 + $0x1d8] sm:$0xff] %v1485_v24 }
 0x22a   :  { %v529_v27 = vpop.f32.mrf.mxu1  ;;  %v1010_v28 = vpop.f32.mrf.mxu0 }
 0x22b   :  { %v1454_v29 = vpack.c.bf16 %v529_v27, %v527_v25  ;;  %v1486_v30 = vpack.c.bf16 %v1010_v28, %v1008_v26 }
 0x22c   :  { %v533_v31 = vpop.f32.mrf.mxu1  ;;  %v1014_v32 = vpop.f32.mrf.mxu0 }
 0x22d   :  { %770 = vst [vmem:[%s1934_s3 + $0xe0] sm:$0xff] %v1454_v29  ;;  %1422 = vst [vmem:[%s1934_s3 + $0x1e0] sm:$0xff] %v1486_v30 }
 0x22e   :  { %v535_v33 = vpop.f32.mrf.mxu1  ;;  %v1016_v34 = vpop.f32.mrf.mxu0 }
 0x22f   :  { %v1455_v35 = vpack.c.bf16 %v535_v33, %v533_v31  ;;  %v1487_v36 = vpack.c.bf16 %v1016_v34, %v1014_v32 }
 0x230   :  { %v539_v37 = vpop.f32.mrf.mxu1  ;;  %v1020_v38 = vpop.f32.mrf.mxu0 }
 0x231   :  { %771 = vst [vmem:[%s1934_s3 + $0xe8] sm:$0xff] %v1455_v35  ;;  %1423 = vst [vmem:[%s1934_s3 + $0x1e8] sm:$0xff] %v1487_v36 }
 0x232   :  { %v541_v39 = vpop.f32.mrf.mxu1  ;;  %v1022_v40 = vpop.f32.mrf.mxu0 }
 0x233   :  { %v1456_v41 = vpack.c.bf16 %v541_v39, %v539_v37  ;;  %v1488_v42 = vpack.c.bf16 %v1022_v40, %v1020_v38 }
 0x234   :  { %v545_v43 = vpop.f32.mrf.mxu1  ;;  %v1026_v44 = vpop.f32.mrf.mxu0 }
 0x235   :  { %772 = vst [vmem:[%s1934_s3 + $0xf0] sm:$0xff] %v1456_v41  ;;  %1424 = vst [vmem:[%s1934_s3 + $0x1f0] sm:$0xff] %v1488_v42 }
 0x236   :  { %v547_v45 = vpop.f32.mrf.mxu1  ;;  %v1028_v46 = vpop.f32.mrf.mxu0 }
 0x237   :  { %v1457_v47 = vpack.c.bf16 %v547_v45, %v545_v43  ;;  %v1489_v48 = vpack.c.bf16 %v1028_v46, %v1026_v44 }
 0x239   :  { %773 = vst [vmem:[%s1934_s3 + $0xf8] sm:$0xff] %v1457_v47  ;;  %1425 = vst [vmem:[%s1934_s3 + $0x1f8] sm:$0xff] %v1489_v48 }
 0x23a   :  { %1260 = vsyncpa [#allocation3], 1 }
 0x23b   :  { %1261 = vsyncpa [#allocation5], 1 }

// kernel: _forward_impl.6
= control target key start
LH: loop header
LB: loop body
LE: loop exit
PB: predicated region body
PF: predicated region fallthrough
CT: control target
= control target key end

     0   :  { %s2442_s1 = inlined_call_operand.vmem [shape: bf16[256,256], index: 1, kind: input, shape index: {}]   ;;  %s2443_s0 = inlined_call_operand.vmem [shape: bf16[512,256], index: 0, kind: input, shape index: {}]   ;;  %s2444_s2 = inlined_call_operand.vmem [shape: f32[1,256], index: 2, kind: input, shape index: {}]   ;;  %s2445_s3 = inlined_call_operand.vmem [shape: bf16[512,256], index: 3, kind: output, shape index: {}]  }
   0x1   :  { %v1663_v0 = vld [vmem:[%s2442_s1 + $0x74] ss:$8 sps:$4 sm:$0xff]   ;;  %v1665_v1 = vld [vmem:[%s2442_s1 + $0x70] ss:$8 sps:$4 sm:$0xff]   ;;  %v1666_v2 = vld [vmem:[%s2442_s1 + $0x64] ss:$8 sps:$4 sm:$0xff]  }
   0x2   :  { %602 = vmatprep.subr.bf16.mxu0 %v1663_v0  ;;  %1631 = vmatprep.subr.bf16.mxu1 %v1663_v0  ;;  %v1668_v3 = vld [vmem:[%s2442_s1 + $0x60] ss:$8 sps:$4 sm:$0xff]   ;;  %v1669_v4 = vld [vmem:[%s2442_s1 + $0x54] ss:$8 sps:$4 sm:$0xff]   ;;  %v1671_v5 = vld [vmem:[%s2442_s1 + $0x50] ss:$8 sps:$4 sm:$0xff]  }
   0x3   :  { %603 = vmatpush1.bf16.msra.mxu0 %v1665_v1  ;;  %1647 = vmatpush1.bf16.msra.mxu1 %v1665_v1  ;;  %v1672_v6 = vld [vmem:[%s2442_s1 + $0x44] ss:$8 sps:$4 sm:$0xff]   ;;  %v1674_v7 = vld [vmem:[%s2442_s1 + $0x40] ss:$8 sps:$4 sm:$0xff]   ;;  %v1675_v8 = vld [vmem:[%s2442_s1 + $0x34] ss:$8 sps:$4 sm:$0xff]  }
   0x4   :  { %604 = vmatprep.subr.bf16.mxu0 %v1666_v2  ;;  %1632 = vmatprep.subr.bf16.mxu1 %v1666_v2  ;;  %v1677_v9 = vld [vmem:[%s2442_s1 + $0x30] ss:$8 sps:$4 sm:$0xff]   ;;  %v1678_v10 = vld [vmem:[%s2442_s1 + $0x24] ss:$8 sps:$4 sm:$0xff]   ;;  %v1680_v11 = vld [vmem:[%s2442_s1 + $0x20] ss:$8 sps:$4 sm:$0xff]  }
   0x5   :  { %v1681_v12 = vld [vmem:[%s2442_s1 + $0x14] ss:$8 sps:$4 sm:$0xff]   ;;  %v1713_v13 = vld [vmem:[%s2443_s0 + $0x4] ss:$8 sps:$4 sm:$0xff]   ;;  %v1683_v14 = vld [vmem:[%s2442_s1 + $0x10] ss:$8 sps:$4 sm:$0xff]  }
   0x6   :  { %v1716_v15 = vld [vmem:[%s2443_s0 + $0x104] ss:$8 sps:$4 sm:$0xff]   ;;  %634 = vmatprep.mubr.bf16.mxu0 %v1713_v13  ;;  %v1686_v17 = vld [vmem:[%s2442_s1] ss:$8 sps:$4 sm:$0xff]   ;;  %v1687_v18 = vld [vmem:[%s2442_s1 + $0xf4] ss:$8 sps:$4 sm:$0xff]  }
   0x7   :  { %605 = vmatpush1.bf16.msra.mxu0 %v1668_v3  ;;  %1648 = vmatpush1.bf16.msra.mxu1 %v1668_v3  ;;  %v1684_v16 = vld [vmem:[%s2442_s1 + $0x4] ss:$8 sps:$4 sm:$0xff]   ;;  %v1689_v19 = vld [vmem:[%s2442_s1 + $0xf0] ss:$8 sps:$4 sm:$0xff]   ;;  %v1692_v21 = vld [vmem:[%s2442_s1 + $0xe0] ss:$8 sps:$4 sm:$0xff]  }
   0x8   :  { %606 = vmatprep.subr.bf16.mxu0 %v1669_v4  ;;  %1633 = vmatprep.subr.bf16.mxu1 %v1669_v4  ;;  %v1690_v20 = vld [vmem:[%s2442_s1 + $0xe4] ss:$8 sps:$4 sm:$0xff]   ;;  %v1693_v22 = vld [vmem:[%s2442_s1 + $0xd4] ss:$8 sps:$4 sm:$0xff]   ;;  %v1695_v23 = vld [vmem:[%s2442_s1 + $0xd0] ss:$8 sps:$4 sm:$0xff]  }
   0x9   :  { %794 = vmatprep.mubr.bf16.mxu1 %v1716_v15  ;;  %v1696_v24 = vld [vmem:[%s2442_s1 + $0xc4] ss:$8 sps:$4 sm:$0xff]   ;;  %v1698_v25 = vld [vmem:[%s2442_s1 + $0xc0] ss:$8 sps:$4 sm:$0xff]   ;;  %v1699_v26 = vld [vmem:[%s2442_s1 + $0xb4] ss:$8 sps:$4 sm:$0xff]  }
   0xa   :  { %v1701_v27 = vld [vmem:[%s2442_s1 + $0xb0] ss:$8 sps:$4 sm:$0xff]   ;;  %v1702_v28 = vld [vmem:[%s2442_s1 + $0xa4] ss:$8 sps:$4 sm:$0xff]   ;;  %v1704_v29 = vld [vmem:[%s2442_s1 + $0xa0] ss:$8 sps:$4 sm:$0xff]  }
   0xb   :  { %607 = vmatpush1.bf16.msra.mxu0 %v1671_v5  ;;  %1649 = vmatpush1.bf16.msra.mxu1 %v1671_v5  ;;  %v1705_v30 = vld [vmem:[%s2442_s1 + $0x94] ss:$8 sps:$4 sm:$0xff]   ;;  %v1707_v31 = vld [vmem:[%s2442_s1 + $0x90] ss:$8 sps:$4 sm:$0xff]   ;;  %v1708_v32 = vld [vmem:[%s2442_s1 + $0x84] ss:$8 sps:$4 sm:$0xff]  }
   0xc   :  { %608 = vmatprep.subr.bf16.mxu0 %v1672_v6  ;;  %1634 = vmatprep.subr.bf16.mxu1 %v1672_v6  ;;  %v1710_v33 = vld [vmem:[%s2442_s1 + $0x80] ss:$8 sps:$4 sm:$0xff]   ;;  %v1717_v36 = vld [vmem:[%s2443_s0 + $0x14] ss:$8 sps:$4 sm:$0xff]   ;;  %v1721_v38 = vld [vmem:[%s2443_s0 + $0x10] ss:$8 sps:$4 sm:$0xff]  }
   0xd   :  { %v1711_v34 = vld [vmem:[%s2443_s0] ss:$8 sps:$4 sm:$0xff]   ;;  %v1719_v37 = vld [vmem:[%s2443_s0 + $0x114] ss:$8 sps:$4 sm:$0xff]   ;;  %v1722_v39 = vld [vmem:[%s2443_s0 + $0x110] ss:$8 sps:$4 sm:$0xff]  }
   0xe   :  { %v1714_v35 = vld [vmem:[%s2443_s0 + $0x100] ss:$8 sps:$4 sm:$0xff]   ;;  %v1723_v40 = vld [vmem:[%s2443_s0 + $0x24] ss:$8 sps:$4 sm:$0xff]   ;;  %v1729_v44 = vld [vmem:[%s2443_s0 + $0x34] ss:$8 sps:$4 sm:$0xff]  }
   0xf   :  { %609 = vmatpush1.bf16.msra.mxu0 %v1674_v7  ;;  %1650 = vmatpush1.bf16.msra.mxu1 %v1674_v7  ;;  %v1725_v41 = vld [vmem:[%s2443_s0 + $0x124] ss:$8 sps:$4 sm:$0xff]   ;;  %v1727_v42 = vld [vmem:[%s2443_s0 + $0x20] ss:$8 sps:$4 sm:$0xff]   ;;  %v1731_v45 = vld [vmem:[%s2443_s0 + $0x134] ss:$8 sps:$4 sm:$0xff]  }
  0x10   :  { %610 = vmatprep.subr.bf16.mxu0 %v1675_v8  ;;  %1635 = vmatprep.subr.bf16.mxu1 %v1675_v8  ;;  %v1728_v43 = vld [vmem:[%s2443_s0 + $0x120] ss:$8 sps:$4 sm:$0xff]   ;;  %v1733_v46 = vld [vmem:[%s2443_s0 + $0x30] ss:$8 sps:$4 sm:$0xff]   ;;  %v1735_v48 = vld [vmem:[%s2443_s0 + $0x44] ss:$8 sps:$4 sm:$0xff]  }
  0x11   :  { %v1734_v47 = vld [vmem:[%s2443_s0 + $0x130] ss:$8 sps:$4 sm:$0xff]   ;;  %v1737_v49 = vld [vmem:[%s2443_s0 + $0x144] ss:$8 sps:$4 sm:$0xff]   ;;  %v1739_v50 = vld [vmem:[%s2443_s0 + $0x40] ss:$8 sps:$4 sm:$0xff]  }
  0x12   :  { %v1740_v51 = vld [vmem:[%s2443_s0 + $0x140] ss:$8 sps:$4 sm:$0xff]   ;;  %v1741_v52 = vld [vmem:[%s2443_s0 + $0x54] ss:$8 sps:$4 sm:$0xff]   ;;  %v1745_v54 = vld [vmem:[%s2443_s0 + $0x50] ss:$8 sps:$4 sm:$0xff]  }
  0x13   :  { %611 = vmatpush1.bf16.msra.mxu0 %v1677_v9  ;;  %1651 = vmatpush1.bf16.msra.mxu1 %v1677_v9  ;;  %v1743_v53 = vld [vmem:[%s2443_s0 + $0x154] ss:$8 sps:$4 sm:$0xff]   ;;  %v1746_v55 = vld [vmem:[%s2443_s0 + $0x150] ss:$8 sps:$4 sm:$0xff]   ;;  %v1747_v56 = vld [vmem:[%s2443_s0 + $0x64] ss:$8 sps:$4 sm:$0xff]  }
  0x14   :  { %612 = vmatprep.subr.bf16.mxu0 %v1678_v10  ;;  %1636 = vmatprep.subr.bf16.mxu1 %v1678_v10  ;;  %v1749_v57 = vld [vmem:[%s2443_s0 + $0x164] ss:$8 sps:$4 sm:$0xff]   ;;  %v1751_v58 = vld [vmem:[%s2443_s0 + $0x60] ss:$8 sps:$4 sm:$0xff]   ;;  %v1753_v60 = vld [vmem:[%s2443_s0 + $0x74] ss:$8 sps:$4 sm:$0xff]  }
  0x15   :  { %v1752_v59 = vld [vmem:[%s2443_s0 + $0x160] ss:$8 sps:$4 sm:$0xff]   ;;  %v1755_v61 = vld [vmem:[%s2443_s0 + $0x174] ss:$8 sps:$4 sm:$0xff]   ;;  %v1757_v62 = vld [vmem:[%s2443_s0 + $0x70] ss:$8 sps:$4 sm:$0xff]  }
  0x16   :  { %v1758_v63 = vld [vmem:[%s2443_s0 + $0x170] ss:$8 sps:$4 sm:$0xff]   ;;  %v1759_v0 = vld [vmem:[%s2443_s0 + $0x84] ss:$8 sps:$4 sm:$0xff]   ;;  %v1763_v2 = vld [vmem:[%s2443_s0 + $0x80] ss:$8 sps:$4 sm:$0xff]  }
  0x17   :  { %613 = vmatpush1.bf16.msra.mxu0 %v1680_v11  ;;  %1652 = vmatpush1.bf16.msra.mxu1 %v1680_v11  ;;  %v1761_v1 = vld [vmem:[%s2443_s0 + $0x184] ss:$8 sps:$4 sm:$0xff]   ;;  %v1764_v3 = vld [vmem:[%s2443_s0 + $0x180] ss:$8 sps:$4 sm:$0xff]   ;;  %v1765_v4 = vld [vmem:[%s2443_s0 + $0x94] ss:$8 sps:$4 sm:$0xff]  }
  0x18   :  { %614 = vmatprep.subr.bf16.mxu0 %v1681_v12  ;;  %1637 = vmatprep.subr.bf16.mxu1 %v1681_v12  ;;  %v1767_v5 = vld [vmem:[%s2443_s0 + $0x194] ss:$8 sps:$4 sm:$0xff]   ;;  %v1769_v6 = vld [vmem:[%s2443_s0 + $0x90] ss:$8 sps:$4 sm:$0xff]   ;;  %v1771_v8 = vld [vmem:[%s2443_s0 + $0xa4] ss:$8 sps:$4 sm:$0xff]  }
  0x19   :  { %v1770_v7 = vld [vmem:[%s2443_s0 + $0x190] ss:$8 sps:$4 sm:$0xff]   ;;  %v1773_v9 = vld [vmem:[%s2443_s0 + $0x1a4] ss:$8 sps:$4 sm:$0xff]   ;;  %v1775_v10 = vld [vmem:[%s2443_s0 + $0xa0] ss:$8 sps:$4 sm:$0xff]  }
  0x1a   :  { %v1776_v11 = vld [vmem:[%s2443_s0 + $0x1a0] ss:$8 sps:$4 sm:$0xff]   ;;  %v1777_v12 = vld [vmem:[%s2443_s0 + $0xb4] ss:$8 sps:$4 sm:$0xff]   ;;  %v1782_v15 = vld [vmem:[%s2443_s0 + $0x1b0] ss:$8 sps:$4 sm:$0xff]  }
  0x1b   :  { %615 = vmatpush1.bf16.msra.mxu0 %v1683_v14  ;;  %1653 = vmatpush1.bf16.msra.mxu1 %v1683_v14  ;;  %v1779_v13 = vld [vmem:[%s2443_s0 + $0x1b4] ss:$8 sps:$4 sm:$0xff]   ;;  %v1781_v14 = vld [vmem:[%s2443_s0 + $0xb0] ss:$8 sps:$4 sm:$0xff]  }
  0x1c   :  { %616 = vmatprep.subr.bf16.mxu0 %v1684_v16  ;;  %1638 = vmatprep.subr.bf16.mxu1 %v1684_v16  ;;  %v1783_v16 = vld [vmem:[%s2443_s0 + $0xc4] ss:$8 sps:$4 sm:$0xff]  }
  0x1f   :  { %617 = vmatpush1.bf16.msra.mxu0 %v1686_v17  ;;  %1654 = vmatpush1.bf16.msra.mxu1 %v1686_v17  ;;  %v1785_v17 = vld [vmem:[%s2443_s0 + $0x1c4] ss:$8 sps:$4 sm:$0xff]  }
  0x20   :  { %618 = vmatprep.subr.bf16.mxu0 %v1687_v18  ;;  %1639 = vmatprep.subr.bf16.mxu1 %v1687_v18  ;;  %v1787_v18 = vld [vmem:[%s2443_s0 + $0xc0] ss:$8 sps:$4 sm:$0xff]  }
  0x23   :  { %619 = vmatpush2.bf16.msra.mxu0 %v1689_v19  ;;  %1655 = vmatpush2.bf16.msra.mxu1 %v1689_v19  ;;  %v1788_v19 = vld [vmem:[%s2443_s0 + $0x1c0] ss:$8 sps:$4 sm:$0xff]  }
  0x24   :  { %620 = vmatprep.subr.bf16.mxu0 %v1690_v20  ;;  %1640 = vmatprep.subr.bf16.mxu1 %v1690_v20  ;;  %v1789_v20 = vld [vmem:[%s2443_s0 + $0xd4] ss:$8 sps:$4 sm:$0xff]  }
  0x27   :  { %621 = vmatpush2.bf16.msra.mxu0 %v1692_v21  ;;  %1656 = vmatpush2.bf16.msra.mxu1 %v1692_v21  ;;  %v1791_v21 = vld [vmem:[%s2443_s0 + $0x1d4] ss:$8 sps:$4 sm:$0xff]  }
  0x28   :  { %622 = vmatprep.subr.bf16.mxu0 %v1693_v22  ;;  %1641 = vmatprep.subr.bf16.mxu1 %v1693_v22  ;;  %v1793_v22 = vld [vmem:[%s2443_s0 + $0xd0] ss:$8 sps:$4 sm:$0xff]  }
  0x2b   :  { %623 = vmatpush2.bf16.msra.mxu0 %v1695_v23  ;;  %1657 = vmatpush2.bf16.msra.mxu1 %v1695_v23  ;;  %v1794_v23 = vld [vmem:[%s2443_s0 + $0x1d0] ss:$8 sps:$4 sm:$0xff]  }
  0x2c   :  { %624 = vmatprep.subr.bf16.mxu0 %v1696_v24  ;;  %1642 = vmatprep.subr.bf16.mxu1 %v1696_v24  ;;  %v1795_v24 = vld [vmem:[%s2443_s0 + $0xe4] ss:$8 sps:$4 sm:$0xff]  }
  0x2f   :  { %625 = vmatpush2.bf16.msra.mxu0 %v1698_v25  ;;  %1658 = vmatpush2.bf16.msra.mxu1 %v1698_v25  ;;  %v1797_v25 = vld [vmem:[%s2443_s0 + $0x1e4] ss:$8 sps:$4 sm:$0xff]  }
  0x30   :  { %626 = vmatprep.subr.bf16.mxu0 %v1699_v26  ;;  %1643 = vmatprep.subr.bf16.mxu1 %v1699_v26  ;;  %v1799_v26 = vld [vmem:[%s2443_s0 + $0xe0] ss:$8 sps:$4 sm:$0xff]  }
  0x33   :  { %627 = vmatpush2.bf16.msra.mxu0 %v1701_v27  ;;  %1659 = vmatpush2.bf16.msra.mxu1 %v1701_v27  ;;  %v1800_v27 = vld [vmem:[%s2443_s0 + $0x1e0] ss:$8 sps:$4 sm:$0xff]  }
  0x34   :  { %628 = vmatprep.subr.bf16.mxu0 %v1702_v28  ;;  %1644 = vmatprep.subr.bf16.mxu1 %v1702_v28  ;;  %v1801_v28 = vld [vmem:[%s2443_s0 + $0xf4] ss:$8 sps:$4 sm:$0xff]  }
  0x37   :  { %629 = vmatpush2.bf16.msra.mxu0 %v1704_v29  ;;  %1660 = vmatpush2.bf16.msra.mxu1 %v1704_v29  ;;  %v1803_v29 = vld [vmem:[%s2443_s0 + $0x1f4] ss:$8 sps:$4 sm:$0xff]  }
  0x38   :  { %630 = vmatprep.subr.bf16.mxu0 %v1705_v30  ;;  %1645 = vmatprep.subr.bf16.mxu1 %v1705_v30  ;;  %v1805_v30 = vld [vmem:[%s2443_s0 + $0xf0] ss:$8 sps:$4 sm:$0xff]  }
  0x3b   :  { %631 = vmatpush2.bf16.msra.mxu0 %v1707_v31  ;;  %1661 = vmatpush2.bf16.msra.mxu1 %v1707_v31  ;;  %v1806_v31 = vld [vmem:[%s2443_s0 + $0x1f0] ss:$8 sps:$4 sm:$0xff]  }
  0x3c   :  { %632 = vmatprep.subr.bf16.mxu0 %v1708_v32  ;;  %1646 = vmatprep.subr.bf16.mxu1 %v1708_v32  ;;  %v112_v32 = vlaneseq }
  0x3f   :  { %633 = vmatpush2.bf16.msra.mxu0 %v1710_v33  ;;  %1662 = vmatpush2.bf16.msra.mxu1 %v1710_v33  ;;  %v113_v33 = vshrl.u32 %v112_v32, 7 }
  0x42   :  { %635 = vmatmul.mubr.bf16.vlgmr.msra.gmra.mxu0 %v1711_v34  ;;  %795 = vmatmul.mubr.bf16.vlgmr.msra.gmra.mxu1 %v1714_v35  ;;  %v114_v34 = vsub.s32 0, %v113_v33  ;;  %v118_v35 = vsub.s32 1, %v113_v33 }
  0x43   :  { %644 = vmatprep.mubr.bf16.mxu0 %v1717_v36  ;;  %804 = vmatprep.mubr.bf16.mxu1 %v1719_v37  ;;  %v110_v36 = vld [vmem:[%s2444_s2] sm:$0x3] }
  0x44   :  { %v2118_v37 = vrot.slane %v110_v36, %v114_v34 }
  0x4a   :  { %645 = vmatmul.mubr.bf16.gmra.mxu0 %v1721_v38  ;;  %805 = vmatmul.mubr.bf16.gmra.mxu1 %v1722_v39  ;;  %v2120_v38 = vrot.slane %v110_v36, %v118_v35 }
  0x4b   :  { %654 = vmatprep.mubr.bf16.mxu0 %v1723_v40  ;;  %814 = vmatprep.mubr.bf16.mxu1 %v1725_v41 }
  0x52   :  { %655 = vmatmul.mubr.bf16.gmra.mxu0 %v1727_v42  ;;  %815 = vmatmul.mubr.bf16.gmra.mxu1 %v1728_v43 }
  0x53   :  { %664 = vmatprep.mubr.bf16.mxu0 %v1729_v44  ;;  %824 = vmatprep.mubr.bf16.mxu1 %v1731_v45 }
  0x5a   :  { %665 = vmatmul.mubr.bf16.gmra.mxu0 %v1733_v46  ;;  %825 = vmatmul.mubr.bf16.gmra.mxu1 %v1734_v47 }
  0x5b   :  { %674 = vmatprep.mubr.bf16.mxu0 %v1735_v48  ;;  %834 = vmatprep.mubr.bf16.mxu1 %v1737_v49 }
  0x62   :  { %675 = vmatmul.mubr.bf16.gmra.mxu0 %v1739_v50  ;;  %835 = vmatmul.mubr.bf16.gmra.mxu1 %v1740_v51 }
  0x63   :  { %684 = vmatprep.mubr.bf16.mxu0 %v1741_v52  ;;  %844 = vmatprep.mubr.bf16.mxu1 %v1743_v53 }
  0x6a   :  { %685 = vmatmul.mubr.bf16.gmra.mxu0 %v1745_v54  ;;  %845 = vmatmul.mubr.bf16.gmra.mxu1 %v1746_v55 }
  0x6b   :  { %694 = vmatprep.mubr.bf16.mxu0 %v1747_v56  ;;  %854 = vmatprep.mubr.bf16.mxu1 %v1749_v57 }
  0x72   :  { %695 = vmatmul.mubr.bf16.gmra.mxu0 %v1751_v58  ;;  %855 = vmatmul.mubr.bf16.gmra.mxu1 %v1752_v59 }
  0x73   :  { %704 = vmatprep.mubr.bf16.mxu0 %v1753_v60  ;;  %864 = vmatprep.mubr.bf16.mxu1 %v1755_v61 }
  0x7a   :  { %705 = vmatmul.mubr.bf16.gmra.mxu0 %v1757_v62  ;;  %865 = vmatmul.mubr.bf16.gmra.mxu1 %v1758_v63 }
  0x7b   :  { %714 = vmatprep.mubr.bf16.mxu0 %v1759_v0  ;;  %874 = vmatprep.mubr.bf16.mxu1 %v1761_v1 }
  0x82   :  { %715 = vmatmul.mubr.bf16.gmra.mxu0 %v1763_v2  ;;  %875 = vmatmul.mubr.bf16.gmra.mxu1 %v1764_v3 }
  0x83   :  { %724 = vmatprep.mubr.bf16.mxu0 %v1765_v4  ;;  %884 = vmatprep.mubr.bf16.mxu1 %v1767_v5 }
  0x8a   :  { %725 = vmatmul.mubr.bf16.gmra.mxu0 %v1769_v6  ;;  %885 = vmatmul.mubr.bf16.gmra.mxu1 %v1770_v7 }
  0x8b   :  { %734 = vmatprep.mubr.bf16.mxu0 %v1771_v8  ;;  %894 = vmatprep.mubr.bf16.mxu1 %v1773_v9 }
  0x92   :  { %735 = vmatmul.mubr.bf16.gmra.mxu0 %v1775_v10  ;;  %895 = vmatmul.mubr.bf16.gmra.mxu1 %v1776_v11 }
  0x93   :  { %744 = vmatprep.mubr.bf16.mxu0 %v1777_v12  ;;  %904 = vmatprep.mubr.bf16.mxu1 %v1779_v13 }
  0x9a   :  { %745 = vmatmul.mubr.bf16.gmra.mxu0 %v1781_v14  ;;  %905 = vmatmul.mubr.bf16.gmra.mxu1 %v1782_v15 }
  0x9b   :  { %754 = vmatprep.mubr.bf16.mxu0 %v1783_v16  ;;  %914 = vmatprep.mubr.bf16.mxu1 %v1785_v17 }
  0xa2   :  { %755 = vmatmul.mubr.bf16.gmra.mxu0 %v1787_v18  ;;  %915 = vmatmul.mubr.bf16.gmra.mxu1 %v1788_v19 }
  0xa3   :  { %764 = vmatprep.mubr.bf16.mxu0 %v1789_v20  ;;  %924 = vmatprep.mubr.bf16.mxu1 %v1791_v21 }
  0xaa   :  { %765 = vmatmul.mubr.bf16.gmra.mxu0 %v1793_v22  ;;  %925 = vmatmul.mubr.bf16.gmra.mxu1 %v1794_v23 }
  0xab   :  { %774 = vmatprep.mubr.bf16.mxu0 %v1795_v24  ;;  %934 = vmatprep.mubr.bf16.mxu1 %v1797_v25 }
  0xb2   :  { %775 = vmatmul.mubr.bf16.gmra.mxu0 %v1799_v26  ;;  %935 = vmatmul.mubr.bf16.gmra.mxu1 %v1800_v27 }
  0xb3   :  { %784 = vmatprep.mubr.bf16.mxu0 %v1801_v28  ;;  %944 = vmatprep.mubr.bf16.mxu1 %v1803_v29 }
  0xba   :  { %785 = vmatmul.mubr.bf16.gmra.mxu0 %v1805_v30  ;;  %945 = vmatmul.mubr.bf16.gmra.mxu1 %v1806_v31 }
 0x102   :  { %v636_v39 = vpop.f32.mrf.mxu0  ;;  %v796_v40 = vpop.f32.mrf.mxu1 }
 0x103   :  { %v637_v43 = vadd.f32 %v636_v39, %v2118_v37  ;;  %v797_v44 = vadd.f32 %v796_v40, %v2118_v37 }
 0x104   :  { %v638_v41 = vpop.f32.mrf.mxu0  ;;  %v798_v42 = vpop.f32.mrf.mxu1 }
 0x105   :  { %v639_v45 = vadd.f32 %v638_v41, %v2120_v38  ;;  %v799_v46 = vadd.f32 %v798_v42, %v2120_v38 }
 0x106   :  { %v640_v47 = vpop.f32.mrf.mxu0  ;;  %v800_v48 = vpop.f32.mrf.mxu1 }
 0x107   :  { %v1567_v49 = vpack.c.bf16 %v639_v45, %v637_v43  ;;  %v1599_v50 = vpack.c.bf16 %v799_v46, %v797_v44  ;;  %v641_v53 = vadd.f32 %v640_v47, %v2118_v37  ;;  %v801_v54 = vadd.f32 %v800_v48, %v2118_v37 }
 0x108   :  { %v642_v51 = vpop.f32.mrf.mxu0  ;;  %v802_v52 = vpop.f32.mrf.mxu1 }
 0x109   :  { %1339 = vst [vmem:[%s2445_s3] sm:$0xff] %v1567_v49  ;;  %1371 = vst [vmem:[%s2445_s3 + $0x100] sm:$0xff] %v1599_v50  ;;  %v643_v55 = vadd.f32 %v642_v51, %v2120_v38  ;;  %v803_v56 = vadd.f32 %v802_v52, %v2120_v38 }
 0x10a   :  { %v646_v57 = vpop.f32.mrf.mxu0  ;;  %v806_v58 = vpop.f32.mrf.mxu1 }
 0x10b   :  { %v1568_v59 = vpack.c.bf16 %v643_v55, %v641_v53  ;;  %v1600_v60 = vpack.c.bf16 %v803_v56, %v801_v54  ;;  %v647_v63 = vadd.f32 %v646_v57, %v2118_v37  ;;  %v807_v0 = vadd.f32 %v806_v58, %v2118_v37 }
 0x10c   :  { %v648_v61 = vpop.f32.mrf.mxu0  ;;  %v808_v62 = vpop.f32.mrf.mxu1 }
 0x10d   :  { %1340 = vst [vmem:[%s2445_s3 + $0x8] sm:$0xff] %v1568_v59  ;;  %1372 = vst [vmem:[%s2445_s3 + $0x108] sm:$0xff] %v1600_v60  ;;  %v649_v1 = vadd.f32 %v648_v61, %v2120_v38  ;;  %v809_v2 = vadd.f32 %v808_v62, %v2120_v38 }
 0x10e   :  { %v650_v3 = vpop.f32.mrf.mxu0  ;;  %v810_v4 = vpop.f32.mrf.mxu1 }
 0x10f   :  { %v1569_v5 = vpack.c.bf16 %v649_v1, %v647_v63  ;;  %v1601_v6 = vpack.c.bf16 %v809_v2, %v807_v0  ;;  %v651_v9 = vadd.f32 %v650_v3, %v2118_v37  ;;  %v811_v10 = vadd.f32 %v810_v4, %v2118_v37 }
 0x110   :  { %v652_v7 = vpop.f32.mrf.mxu0  ;;  %v812_v8 = vpop.f32.mrf.mxu1 }
 0x111   :  { %1341 = vst [vmem:[%s2445_s3 + $0x10] sm:$0xff] %v1569_v5  ;;  %1373 = vst [vmem:[%s2445_s3 + $0x110] sm:$0xff] %v1601_v6  ;;  %v653_v11 = vadd.f32 %v652_v7, %v2120_v38  ;;  %v813_v12 = vadd.f32 %v812_v8, %v2120_v38 }
 0x112   :  { %v656_v13 = vpop.f32.mrf.mxu0  ;;  %v816_v14 = vpop.f32.mrf.mxu1 }
 0x113   :  { %v1570_v15 = vpack.c.bf16 %v653_v11, %v651_v9  ;;  %v1602_v16 = vpack.c.bf16 %v813_v12, %v811_v10  ;;  %v657_v19 = vadd.f32 %v656_v13, %v2118_v37  ;;  %v817_v20 = vadd.f32 %v816_v14, %v2118_v37 }
 0x114   :  { %v658_v17 = vpop.f32.mrf.mxu0  ;;  %v818_v18 = vpop.f32.mrf.mxu1 }
 0x115   :  { %1342 = vst [vmem:[%s2445_s3 + $0x18] sm:$0xff] %v1570_v15  ;;  %1374 = vst [vmem:[%s2445_s3 + $0x118] sm:$0xff] %v1602_v16  ;;  %v659_v21 = vadd.f32 %v658_v17, %v2120_v38  ;;  %v819_v22 = vadd.f32 %v818_v18, %v2120_v38 }
 0x116   :  { %v660_v23 = vpop.f32.mrf.mxu0  ;;  %v820_v24 = vpop.f32.mrf.mxu1 }
 0x117   :  { %v1571_v25 = vpack.c.bf16 %v659_v21, %v657_v19  ;;  %v1603_v26 = vpack.c.bf16 %v819_v22, %v817_v20  ;;  %v661_v29 = vadd.f32 %v660_v23, %v2118_v37  ;;  %v821_v30 = vadd.f32 %v820_v24, %v2118_v37 }
 0x118   :  { %v662_v27 = vpop.f32.mrf.mxu0  ;;  %v822_v28 = vpop.f32.mrf.mxu1 }
 0x119   :  { %1343 = vst [vmem:[%s2445_s3 + $0x20] sm:$0xff] %v1571_v25  ;;  %1375 = vst [vmem:[%s2445_s3 + $0x120] sm:$0xff] %v1603_v26  ;;  %v663_v31 = vadd.f32 %v662_v27, %v2120_v38  ;;  %v823_v32 = vadd.f32 %v822_v28, %v2120_v38 }
 0x11a   :  { %v666_v33 = vpop.f32.mrf.mxu0  ;;  %v826_v34 = vpop.f32.mrf.mxu1 }
 0x11b   :  { %v1572_v35 = vpack.c.bf16 %v663_v31, %v661_v29  ;;  %v1604_v36 = vpack.c.bf16 %v823_v32, %v821_v30  ;;  %v667_v41 = vadd.f32 %v666_v33, %v2118_v37  ;;  %v827_v42 = vadd.f32 %v826_v34, %v2118_v37 }
 0x11c   :  { %v668_v39 = vpop.f32.mrf.mxu0  ;;  %v828_v40 = vpop.f32.mrf.mxu1 }
 0x11d   :  { %1344 = vst [vmem:[%s2445_s3 + $0x28] sm:$0xff] %v1572_v35  ;;  %1376 = vst [vmem:[%s2445_s3 + $0x128] sm:$0xff] %v1604_v36  ;;  %v669_v43 = vadd.f32 %v668_v39, %v2120_v38  ;;  %v829_v44 = vadd.f32 %v828_v40, %v2120_v38 }
 0x11e   :  { %v670_v45 = vpop.f32.mrf.mxu0  ;;  %v830_v46 = vpop.f32.mrf.mxu1 }
 0x11f   :  { %v1573_v47 = vpack.c.bf16 %v669_v43, %v667_v41  ;;  %v1605_v48 = vpack.c.bf16 %v829_v44, %v827_v42  ;;  %v671_v51 = vadd.f32 %v670_v45, %v2118_v37  ;;  %v831_v52 = vadd.f32 %v830_v46, %v2118_v37 }
 0x120   :  { %v672_v49 = vpop.f32.mrf.mxu0  ;;  %v832_v50 = vpop.f32.mrf.mxu1 }
 0x121   :  { %1345 = vst [vmem:[%s2445_s3 + $0x30] sm:$0xff] %v1573_v47  ;;  %1377 = vst [vmem:[%s2445_s3 + $0x130] sm:$0xff] %v1605_v48  ;;  %v673_v53 = vadd.f32 %v672_v49, %v2120_v38  ;;  %v833_v54 = vadd.f32 %v832_v50, %v2120_v38 }
 0x122   :  { %v676_v55 = vpop.f32.mrf.mxu0  ;;  %v836_v56 = vpop.f32.mrf.mxu1 }
 0x123   :  { %v1574_v57 = vpack.c.bf16 %v673_v53, %v671_v51  ;;  %v1606_v58 = vpack.c.bf16 %v833_v54, %v831_v52  ;;  %v677_v61 = vadd.f32 %v676_v55, %v2118_v37  ;;  %v837_v62 = vadd.f32 %v836_v56, %v2118_v37 }
 0x124   :  { %v678_v59 = vpop.f32.mrf.mxu0  ;;  %v838_v60 = vpop.f32.mrf.mxu1 }
 0x125   :  { %1346 = vst [vmem:[%s2445_s3 + $0x38] sm:$0xff] %v1574_v57  ;;  %1378 = vst [vmem:[%s2445_s3 + $0x138] sm:$0xff] %v1606_v58  ;;  %v679_v63 = vadd.f32 %v678_v59, %v2120_v38  ;;  %v839_v0 = vadd.f32 %v838_v60, %v2120_v38 }
 0x126   :  { %v680_v1 = vpop.f32.mrf.mxu0  ;;  %v840_v2 = vpop.f32.mrf.mxu1 }
 0x127   :  { %v1575_v3 = vpack.c.bf16 %v679_v63, %v677_v61  ;;  %v1607_v4 = vpack.c.bf16 %v839_v0, %v837_v62  ;;  %v681_v7 = vadd.f32 %v680_v1, %v2118_v37  ;;  %v841_v8 = vadd.f32 %v840_v2, %v2118_v37 }
 0x128   :  { %v682_v5 = vpop.f32.mrf.mxu0  ;;  %v842_v6 = vpop.f32.mrf.mxu1 }
 0x129   :  { %1347 = vst [vmem:[%s2445_s3 + $0x40] sm:$0xff] %v1575_v3  ;;  %1379 = vst [vmem:[%s2445_s3 + $0x140] sm:$0xff] %v1607_v4  ;;  %v683_v9 = vadd.f32 %v682_v5, %v2120_v38  ;;  %v843_v10 = vadd.f32 %v842_v6, %v2120_v38 }
 0x12a   :  { %v686_v11 = vpop.f32.mrf.mxu0  ;;  %v846_v12 = vpop.f32.mrf.mxu1 }
 0x12b   :  { %v1576_v13 = vpack.c.bf16 %v683_v9, %v681_v7  ;;  %v1608_v14 = vpack.c.bf16 %v843_v10, %v841_v8  ;;  %v687_v17 = vadd.f32 %v686_v11, %v2118_v37  ;;  %v847_v18 = vadd.f32 %v846_v12, %v2118_v37 }
 0x12c   :  { %v688_v15 = vpop.f32.mrf.mxu0  ;;  %v848_v16 = vpop.f32.mrf.mxu1 }
 0x12d   :  { %1348 = vst [vmem:[%s2445_s3 + $0x48] sm:$0xff] %v1576_v13  ;;  %1380 = vst [vmem:[%s2445_s3 + $0x148] sm:$0xff] %v1608_v14  ;;  %v689_v19 = vadd.f32 %v688_v15, %v2120_v38  ;;  %v849_v20 = vadd.f32 %v848_v16, %v2120_v38 }
 0x12e   :  { %v690_v21 = vpop.f32.mrf.mxu0  ;;  %v850_v22 = vpop.f32.mrf.mxu1 }
 0x12f   :  { %v1577_v23 = vpack.c.bf16 %v689_v19, %v687_v17  ;;  %v1609_v24 = vpack.c.bf16 %v849_v20, %v847_v18  ;;  %v691_v27 = vadd.f32 %v690_v21, %v2118_v37  ;;  %v851_v28 = vadd.f32 %v850_v22, %v2118_v37 }
 0x130   :  { %v692_v25 = vpop.f32.mrf.mxu0  ;;  %v852_v26 = vpop.f32.mrf.mxu1 }
 0x131   :  { %1349 = vst [vmem:[%s2445_s3 + $0x50] sm:$0xff] %v1577_v23  ;;  %1381 = vst [vmem:[%s2445_s3 + $0x150] sm:$0xff] %v1609_v24  ;;  %v693_v29 = vadd.f32 %v692_v25, %v2120_v38  ;;  %v853_v30 = vadd.f32 %v852_v26, %v2120_v38 }
 0x132   :  { %v696_v31 = vpop.f32.mrf.mxu0  ;;  %v856_v32 = vpop.f32.mrf.mxu1 }
 0x133   :  { %v1578_v33 = vpack.c.bf16 %v693_v29, %v691_v27  ;;  %v1610_v34 = vpack.c.bf16 %v853_v30, %v851_v28  ;;  %v697_v39 = vadd.f32 %v696_v31, %v2118_v37  ;;  %v857_v40 = vadd.f32 %v856_v32, %v2118_v37 }
 0x134   :  { %v698_v35 = vpop.f32.mrf.mxu0  ;;  %v858_v36 = vpop.f32.mrf.mxu1 }
 0x135   :  { %1350 = vst [vmem:[%s2445_s3 + $0x58] sm:$0xff] %v1578_v33  ;;  %1382 = vst [vmem:[%s2445_s3 + $0x158] sm:$0xff] %v1610_v34  ;;  %v699_v41 = vadd.f32 %v698_v35, %v2120_v38  ;;  %v859_v42 = vadd.f32 %v858_v36, %v2120_v38 }
 0x136   :  { %v700_v43 = vpop.f32.mrf.mxu0  ;;  %v860_v44 = vpop.f32.mrf.mxu1 }
 0x137   :  { %v1579_v45 = vpack.c.bf16 %v699_v41, %v697_v39  ;;  %v1611_v46 = vpack.c.bf16 %v859_v42, %v857_v40  ;;  %v701_v49 = vadd.f32 %v700_v43, %v2118_v37  ;;  %v861_v50 = vadd.f32 %v860_v44, %v2118_v37 }
 0x138   :  { %v702_v47 = vpop.f32.mrf.mxu0  ;;  %v862_v48 = vpop.f32.mrf.mxu1 }
 0x139   :  { %1351 = vst [vmem:[%s2445_s3 + $0x60] sm:$0xff] %v1579_v45  ;;  %1383 = vst [vmem:[%s2445_s3 + $0x160] sm:$0xff] %v1611_v46  ;;  %v703_v51 = vadd.f32 %v702_v47, %v2120_v38  ;;  %v863_v52 = vadd.f32 %v862_v48, %v2120_v38 }
 0x13a   :  { %v706_v53 = vpop.f32.mrf.mxu0  ;;  %v866_v54 = vpop.f32.mrf.mxu1 }
 0x13b   :  { %v1580_v55 = vpack.c.bf16 %v703_v51, %v701_v49  ;;  %v1612_v56 = vpack.c.bf16 %v863_v52, %v861_v50  ;;  %v707_v59 = vadd.f32 %v706_v53, %v2118_v37  ;;  %v867_v60 = vadd.f32 %v866_v54, %v2118_v37 }
 0x13c   :  { %v708_v57 = vpop.f32.mrf.mxu0  ;;  %v868_v58 = vpop.f32.mrf.mxu1 }
 0x13d   :  { %1352 = vst [vmem:[%s2445_s3 + $0x68] sm:$0xff] %v1580_v55  ;;  %1384 = vst [vmem:[%s2445_s3 + $0x168] sm:$0xff] %v1612_v56  ;;  %v709_v61 = vadd.f32 %v708_v57, %v2120_v38  ;;  %v869_v62 = vadd.f32 %v868_v58, %v2120_v38 }
 0x13e   :  { %v710_v63 = vpop.f32.mrf.mxu0  ;;  %v870_v0 = vpop.f32.mrf.mxu1 }
 0x13f   :  { %v1581_v1 = vpack.c.bf16 %v709_v61, %v707_v59  ;;  %v1613_v2 = vpack.c.bf16 %v869_v62, %v867_v60  ;;  %v711_v5 = vadd.f32 %v710_v63, %v2118_v37  ;;  %v871_v6 = vadd.f32 %v870_v0, %v2118_v37 }
 0x140   :  { %v712_v3 = vpop.f32.mrf.mxu0  ;;  %v872_v4 = vpop.f32.mrf.mxu1 }
 0x141   :  { %1353 = vst [vmem:[%s2445_s3 + $0x70] sm:$0xff] %v1581_v1  ;;  %1385 = vst [vmem:[%s2445_s3 + $0x170] sm:$0xff] %v1613_v2  ;;  %v713_v7 = vadd.f32 %v712_v3, %v2120_v38  ;;  %v873_v8 = vadd.f32 %v872_v4, %v2120_v38 }
 0x142   :  { %v716_v9 = vpop.f32.mrf.mxu0  ;;  %v876_v10 = vpop.f32.mrf.mxu1 }
 0x143   :  { %v1582_v11 = vpack.c.bf16 %v713_v7, %v711_v5  ;;  %v1614_v12 = vpack.c.bf16 %v873_v8, %v871_v6  ;;  %v717_v15 = vadd.f32 %v716_v9, %v2118_v37  ;;  %v877_v16 = vadd.f32 %v876_v10, %v2118_v37 }
 0x144   :  { %v718_v13 = vpop.f32.mrf.mxu0  ;;  %v878_v14 = vpop.f32.mrf.mxu1 }
 0x145   :  { %1354 = vst [vmem:[%s2445_s3 + $0x78] sm:$0xff] %v1582_v11  ;;  %1386 = vst [vmem:[%s2445_s3 + $0x178] sm:$0xff] %v1614_v12  ;;  %v719_v17 = vadd.f32 %v718_v13, %v2120_v38  ;;  %v879_v18 = vadd.f32 %v878_v14, %v2120_v38 }
 0x146   :  { %v720_v19 = vpop.f32.mrf.mxu0  ;;  %v880_v20 = vpop.f32.mrf.mxu1 }
 0x147   :  { %v1583_v21 = vpack.c.bf16 %v719_v17, %v717_v15  ;;  %v1615_v22 = vpack.c.bf16 %v879_v18, %v877_v16  ;;  %v721_v25 = vadd.f32 %v720_v19, %v2118_v37  ;;  %v881_v26 = vadd.f32 %v880_v20, %v2118_v37 }
 0x148   :  { %v722_v23 = vpop.f32.mrf.mxu0  ;;  %v882_v24 = vpop.f32.mrf.mxu1 }
 0x149   :  { %1355 = vst [vmem:[%s2445_s3 + $0x80] sm:$0xff] %v1583_v21  ;;  %1387 = vst [vmem:[%s2445_s3 + $0x180] sm:$0xff] %v1615_v22  ;;  %v723_v27 = vadd.f32 %v722_v23, %v2120_v38  ;;  %v883_v28 = vadd.f32 %v882_v24, %v2120_v38 }
 0x14a   :  { %v726_v29 = vpop.f32.mrf.mxu0  ;;  %v886_v30 = vpop.f32.mrf.mxu1 }
 0x14b   :  { %v1584_v31 = vpack.c.bf16 %v723_v27, %v721_v25  ;;  %v1616_v32 = vpack.c.bf16 %v883_v28, %v881_v26  ;;  %v727_v35 = vadd.f32 %v726_v29, %v2118_v37  ;;  %v887_v36 = vadd.f32 %v886_v30, %v2118_v37 }
 0x14c   :  { %v728_v33 = vpop.f32.mrf.mxu0  ;;  %v888_v34 = vpop.f32.mrf.mxu1 }
 0x14d   :  { %1356 = vst [vmem:[%s2445_s3 + $0x88] sm:$0xff] %v1584_v31  ;;  %1388 = vst [vmem:[%s2445_s3 + $0x188] sm:$0xff] %v1616_v32  ;;  %v729_v39 = vadd.f32 %v728_v33, %v2120_v38  ;;  %v889_v40 = vadd.f32 %v888_v34, %v2120_v38 }
 0x14e   :  { %v730_v41 = vpop.f32.mrf.mxu0  ;;  %v890_v42 = vpop.f32.mrf.mxu1 }
 0x14f   :  { %v1585_v43 = vpack.c.bf16 %v729_v39, %v727_v35  ;;  %v1617_v44 = vpack.c.bf16 %v889_v40, %v887_v36  ;;  %v731_v47 = vadd.f32 %v730_v41, %v2118_v37  ;;  %v891_v48 = vadd.f32 %v890_v42, %v2118_v37 }
 0x150   :  { %v732_v45 = vpop.f32.mrf.mxu0  ;;  %v892_v46 = vpop.f32.mrf.mxu1 }
 0x151   :  { %1357 = vst [vmem:[%s2445_s3 + $0x90] sm:$0xff] %v1585_v43  ;;  %1389 = vst [vmem:[%s2445_s3 + $0x190] sm:$0xff] %v1617_v44  ;;  %v733_v49 = vadd.f32 %v732_v45, %v2120_v38  ;;  %v893_v50 = vadd.f32 %v892_v46, %v2120_v38 }
 0x152   :  { %v736_v51 = vpop.f32.mrf.mxu0  ;;  %v896_v52 = vpop.f32.mrf.mxu1 }
 0x153   :  { %v1586_v53 = vpack.c.bf16 %v733_v49, %v731_v47  ;;  %v1618_v54 = vpack.c.bf16 %v893_v50, %v891_v48  ;;  %v737_v57 = vadd.f32 %v736_v51, %v2118_v37  ;;  %v897_v58 = vadd.f32 %v896_v52, %v2118_v37 }
 0x154   :  { %v738_v55 = vpop.f32.mrf.mxu0  ;;  %v898_v56 = vpop.f32.mrf.mxu1 }
 0x155   :  { %1358 = vst [vmem:[%s2445_s3 + $0x98] sm:$0xff] %v1586_v53  ;;  %1390 = vst [vmem:[%s2445_s3 + $0x198] sm:$0xff] %v1618_v54  ;;  %v739_v59 = vadd.f32 %v738_v55, %v2120_v38  ;;  %v899_v60 = vadd.f32 %v898_v56, %v2120_v38 }
 0x156   :  { %v740_v61 = vpop.f32.mrf.mxu0  ;;  %v900_v62 = vpop.f32.mrf.mxu1 }
 0x157   :  { %v1587_v63 = vpack.c.bf16 %v739_v59, %v737_v57  ;;  %v1619_v0 = vpack.c.bf16 %v899_v60, %v897_v58  ;;  %v741_v3 = vadd.f32 %v740_v61, %v2118_v37  ;;  %v901_v4 = vadd.f32 %v900_v62, %v2118_v37 }
 0x158   :  { %v742_v1 = vpop.f32.mrf.mxu0  ;;  %v902_v2 = vpop.f32.mrf.mxu1 }
 0x159   :  { %1359 = vst [vmem:[%s2445_s3 + $0xa0] sm:$0xff] %v1587_v63  ;;  %1391 = vst [vmem:[%s2445_s3 + $0x1a0] sm:$0xff] %v1619_v0  ;;  %v743_v5 = vadd.f32 %v742_v1, %v2120_v38  ;;  %v903_v6 = vadd.f32 %v902_v2, %v2120_v38 }
 0x15a   :  { %v746_v7 = vpop.f32.mrf.mxu0  ;;  %v906_v8 = vpop.f32.mrf.mxu1 }
 0x15b   :  { %v1588_v9 = vpack.c.bf16 %v743_v5, %v741_v3  ;;  %v1620_v10 = vpack.c.bf16 %v903_v6, %v901_v4  ;;  %v747_v13 = vadd.f32 %v746_v7, %v2118_v37  ;;  %v907_v14 = vadd.f32 %v906_v8, %v2118_v37 }
 0x15c   :  { %v748_v11 = vpop.f32.mrf.mxu0  ;;  %v908_v12 = vpop.f32.mrf.mxu1 }
 0x15d   :  { %1360 = vst [vmem:[%s2445_s3 + $0xa8] sm:$0xff] %v1588_v9  ;;  %1392 = vst [vmem:[%s2445_s3 + $0x1a8] sm:$0xff] %v1620_v10  ;;  %v749_v15 = vadd.f32 %v748_v11, %v2120_v38  ;;  %v909_v16 = vadd.f32 %v908_v12, %v2120_v38 }
 0x15e   :  { %v750_v17 = vpop.f32.mrf.mxu0  ;;  %v910_v18 = vpop.f32.mrf.mxu1 }
 0x15f   :  { %v1589_v19 = vpack.c.bf16 %v749_v15, %v747_v13  ;;  %v1621_v20 = vpack.c.bf16 %v909_v16, %v907_v14  ;;  %v751_v23 = vadd.f32 %v750_v17, %v2118_v37  ;;  %v911_v24 = vadd.f32 %v910_v18, %v2118_v37 }
 0x160   :  { %v752_v21 = vpop.f32.mrf.mxu0  ;;  %v912_v22 = vpop.f32.mrf.mxu1 }
 0x161   :  { %1361 = vst [vmem:[%s2445_s3 + $0xb0] sm:$0xff] %v1589_v19  ;;  %1393 = vst [vmem:[%s2445_s3 + $0x1b0] sm:$0xff] %v1621_v20  ;;  %v753_v25 = vadd.f32 %v752_v21, %v2120_v38  ;;  %v913_v26 = vadd.f32 %v912_v22, %v2120_v38 }
 0x162   :  { %v756_v27 = vpop.f32.mrf.mxu0  ;;  %v916_v28 = vpop.f32.mrf.mxu1 }
 0x163   :  { %v1590_v29 = vpack.c.bf16 %v753_v25, %v751_v23  ;;  %v1622_v30 = vpack.c.bf16 %v913_v26, %v911_v24  ;;  %v757_v33 = vadd.f32 %v756_v27, %v2118_v37  ;;  %v917_v34 = vadd.f32 %v916_v28, %v2118_v37 }
 0x164   :  { %v758_v31 = vpop.f32.mrf.mxu0  ;;  %v918_v32 = vpop.f32.mrf.mxu1 }
 0x165   :  { %1362 = vst [vmem:[%s2445_s3 + $0xb8] sm:$0xff] %v1590_v29  ;;  %1394 = vst [vmem:[%s2445_s3 + $0x1b8] sm:$0xff] %v1622_v30  ;;  %v759_v35 = vadd.f32 %v758_v31, %v2120_v38  ;;  %v919_v36 = vadd.f32 %v918_v32, %v2120_v38 }
 0x166   :  { %v760_v39 = vpop.f32.mrf.mxu0  ;;  %v920_v40 = vpop.f32.mrf.mxu1 }
 0x167   :  { %v1591_v41 = vpack.c.bf16 %v759_v35, %v757_v33  ;;  %v1623_v42 = vpack.c.bf16 %v919_v36, %v917_v34  ;;  %v761_v45 = vadd.f32 %v760_v39, %v2118_v37  ;;  %v921_v46 = vadd.f32 %v920_v40, %v2118_v37 }
 0x168   :  { %v762_v43 = vpop.f32.mrf.mxu0  ;;  %v922_v44 = vpop.f32.mrf.mxu1 }
 0x169   :  { %1363 = vst [vmem:[%s2445_s3 + $0xc0] sm:$0xff] %v1591_v41  ;;  %1395 = vst [vmem:[%s2445_s3 + $0x1c0] sm:$0xff] %v1623_v42  ;;  %v763_v47 = vadd.f32 %v762_v43, %v2120_v38  ;;  %v923_v48 = vadd.f32 %v922_v44, %v2120_v38 }
 0x16a   :  { %v766_v49 = vpop.f32.mrf.mxu0  ;;  %v926_v50 = vpop.f32.mrf.mxu1 }
 0x16b   :  { %v1592_v51 = vpack.c.bf16 %v763_v47, %v761_v45  ;;  %v1624_v52 = vpack.c.bf16 %v923_v48, %v921_v46  ;;  %v767_v55 = vadd.f32 %v766_v49, %v2118_v37  ;;  %v927_v56 = vadd.f32 %v926_v50, %v2118_v37 }
 0x16c   :  { %v768_v53 = vpop.f32.mrf.mxu0  ;;  %v928_v54 = vpop.f32.mrf.mxu1 }
 0x16d   :  { %1364 = vst [vmem:[%s2445_s3 + $0xc8] sm:$0xff] %v1592_v51  ;;  %1396 = vst [vmem:[%s2445_s3 + $0x1c8] sm:$0xff] %v1624_v52  ;;  %v769_v57 = vadd.f32 %v768_v53, %v2120_v38  ;;  %v929_v58 = vadd.f32 %v928_v54, %v2120_v38 }
 0x16e   :  { %v770_v59 = vpop.f32.mrf.mxu0  ;;  %v930_v60 = vpop.f32.mrf.mxu1 }
 0x16f   :  { %v1593_v61 = vpack.c.bf16 %v769_v57, %v767_v55  ;;  %v1625_v62 = vpack.c.bf16 %v929_v58, %v927_v56  ;;  %v771_v1 = vadd.f32 %v770_v59, %v2118_v37  ;;  %v931_v2 = vadd.f32 %v930_v60, %v2118_v37 }
 0x170   :  { %v772_v63 = vpop.f32.mrf.mxu0  ;;  %v932_v0 = vpop.f32.mrf.mxu1 }
 0x171   :  { %1365 = vst [vmem:[%s2445_s3 + $0xd0] sm:$0xff] %v1593_v61  ;;  %1397 = vst [vmem:[%s2445_s3 + $0x1d0] sm:$0xff] %v1625_v62  ;;  %v773_v3 = vadd.f32 %v772_v63, %v2120_v38  ;;  %v933_v4 = vadd.f32 %v932_v0, %v2120_v38 }
 0x172   :  { %v776_v5 = vpop.f32.mrf.mxu0  ;;  %v936_v6 = vpop.f32.mrf.mxu1 }
 0x173   :  { %v1594_v7 = vpack.c.bf16 %v773_v3, %v771_v1  ;;  %v1626_v8 = vpack.c.bf16 %v933_v4, %v931_v2  ;;  %v777_v11 = vadd.f32 %v776_v5, %v2118_v37  ;;  %v937_v12 = vadd.f32 %v936_v6, %v2118_v37 }
 0x174   :  { %v778_v9 = vpop.f32.mrf.mxu0  ;;  %v938_v10 = vpop.f32.mrf.mxu1 }
 0x175   :  { %1366 = vst [vmem:[%s2445_s3 + $0xd8] sm:$0xff] %v1594_v7  ;;  %1398 = vst [vmem:[%s2445_s3 + $0x1d8] sm:$0xff] %v1626_v8  ;;  %v779_v13 = vadd.f32 %v778_v9, %v2120_v38  ;;  %v939_v14 = vadd.f32 %v938_v10, %v2120_v38 }
 0x176   :  { %v780_v15 = vpop.f32.mrf.mxu0  ;;  %v940_v16 = vpop.f32.mrf.mxu1 }
 0x177   :  { %v1595_v17 = vpack.c.bf16 %v779_v13, %v777_v11  ;;  %v1627_v18 = vpack.c.bf16 %v939_v14, %v937_v12  ;;  %v781_v21 = vadd.f32 %v780_v15, %v2118_v37  ;;  %v941_v22 = vadd.f32 %v940_v16, %v2118_v37 }
 0x178   :  { %v782_v19 = vpop.f32.mrf.mxu0  ;;  %v942_v20 = vpop.f32.mrf.mxu1 }
 0x179   :  { %1367 = vst [vmem:[%s2445_s3 + $0xe0] sm:$0xff] %v1595_v17  ;;  %1399 = vst [vmem:[%s2445_s3 + $0x1e0] sm:$0xff] %v1627_v18  ;;  %v783_v23 = vadd.f32 %v782_v19, %v2120_v38  ;;  %v943_v24 = vadd.f32 %v942_v20, %v2120_v38 }
 0x17a   :  { %v786_v25 = vpop.f32.mrf.mxu0  ;;  %v946_v26 = vpop.f32.mrf.mxu1 }
 0x17b   :  { %v1596_v27 = vpack.c.bf16 %v783_v23, %v781_v21  ;;  %v1628_v28 = vpack.c.bf16 %v943_v24, %v941_v22  ;;  %v787_v31 = vadd.f32 %v786_v25, %v2118_v37  ;;  %v947_v32 = vadd.f32 %v946_v26, %v2118_v37 }
 0x17c   :  { %v788_v29 = vpop.f32.mrf.mxu0  ;;  %v948_v30 = vpop.f32.mrf.mxu1 }
 0x17d   :  { %1368 = vst [vmem:[%s2445_s3 + $0xe8] sm:$0xff] %v1596_v27  ;;  %1400 = vst [vmem:[%s2445_s3 + $0x1e8] sm:$0xff] %v1628_v28  ;;  %v789_v33 = vadd.f32 %v788_v29, %v2120_v38  ;;  %v949_v34 = vadd.f32 %v948_v30, %v2120_v38 }
 0x17e   :  { %v790_v35 = vpop.f32.mrf.mxu0  ;;  %v950_v36 = vpop.f32.mrf.mxu1 }
 0x17f   :  { %v1597_v39 = vpack.c.bf16 %v789_v33, %v787_v31  ;;  %v1629_v40 = vpack.c.bf16 %v949_v34, %v947_v32  ;;  %v791_v43 = vadd.f32 %v790_v35, %v2118_v37  ;;  %v951_v44 = vadd.f32 %v950_v36, %v2118_v37 }
 0x180   :  { %v792_v41 = vpop.f32.mrf.mxu0  ;;  %v952_v42 = vpop.f32.mrf.mxu1 }
 0x181   :  { %1369 = vst [vmem:[%s2445_s3 + $0xf0] sm:$0xff] %v1597_v39  ;;  %1401 = vst [vmem:[%s2445_s3 + $0x1f0] sm:$0xff] %v1629_v40  ;;  %v793_v45 = vadd.f32 %v792_v41, %v2120_v38  ;;  %v953_v46 = vadd.f32 %v952_v42, %v2120_v38 }
 0x183   :  { %v1598_v47 = vpack.c.bf16 %v793_v45, %v791_v43  ;;  %v1630_v48 = vpack.c.bf16 %v953_v46, %v951_v44 }
 0x185   :  { %1370 = vst [vmem:[%s2445_s3 + $0xf8] sm:$0xff] %v1598_v47  ;;  %1402 = vst [vmem:[%s2445_s3 + $0x1f8] sm:$0xff] %v1630_v48 }

// kernel: _forward_impl.8
= control target key start
LH: loop header
LB: loop body
LE: loop exit
PB: predicated region body
PF: predicated region fallthrough
CT: control target
= control target key end

     0   :  { %s628_s9 = smov 0   ;;  %s687_s0 = inlined_call_operand.vmem [shape: bf16[2,2,256], index: 0, kind: input, shape index: {}]   ;;  %s688_s1 = inlined_call_operand.vmem [shape: bf16[2,256,256], index: 1, kind: input, shape index: {}]   ;;  %s689_s2 = inlined_call_operand.vmem [shape: f32[2,2,256], index: 2, kind: output, shape index: {}]  }
   0x1 LB: > { %s499_s10 = sadd.s32 4294967295, %s610_s9   ;;  %p503_p0 = scmp.ge.s32.totalorder %s610_s9, 1  ;;  %s610_s9 = sphi %s628_s9, %s12_s9  }
   0x2   : > { %p121_p1 = scmp.lt.s32.totalorder %s610_s9, 3 }
   0x4   : > { %p122_p2 = pnand %p503_p0, %p121_p1 }
   0x5   : > { %p147_p3 = scmp.lt.s32.totalorder (!%p122_p2), %s499_s10, 1 }
   0x6   : > { %125 = sbr.rel (%p122_p2) target bundleno = 342 (0x156), region = 28 }
   0xb   : > { %s691_s10 = smov (!%p147_p3, %s499_s10), 1  ;;  %v612_v5 = vmov 1966171168   ;;  %v206_v7 = vlaneseq }
   0xc   : > { %s545_s11 = sshll.u32 %s691_s10, 8  ;;  %v204_v6 = vunpack.c.l.s4 %v612_v5  ;;  %s504_s15 = sshll.u32 %s691_s10, 1 }
   0xd   : > { %s642_s14 = scalar_lea.vmem %s688_s1, %s545_s11  ;;  %v207_v9 = vshrl.u32 %v206_v7, 7  ;;  %s150_s18 = scalar_lea.vmem %s687_s0, %s504_s15 }
   0xe   : > { %v556_v0 = vld [vmem:[%s642_s14 + $0x74] ss:$8 sps:$4 sm:$0xff]   ;;  %v558_v1 = vld [vmem:[%s642_s14 + $0x70] ss:$8 sps:$4 sm:$0xff]   ;;  %v559_v2 = vld [vmem:[%s642_s14 + $0x64] ss:$8 sps:$4 sm:$0xff]   ;;  %v205_v8 = vunpack.c.0.s8 %v204_v6 }
   0xf   : > { %379 = vmatprep.subr.bf16.mxu0 %v556_v0  ;;  %v561_v3 = vld [vmem:[%s642_s14 + $0x60] ss:$8 sps:$4 sm:$0xff]   ;;  %v562_v4 = vld [vmem:[%s642_s14 + $0x54] ss:$8 sps:$4 sm:$0xff]   ;;  %v564_v10 = vld [vmem:[%s642_s14 + $0x50] ss:$8 sps:$4 sm:$0xff]  }
  0x10   : > { %380 = vmatpush1.bf16.xpose.msra.mxu0 %v558_v1  ;;  %v565_v11 = vld [vmem:[%s642_s14 + $0x44] ss:$8 sps:$4 sm:$0xff]   ;;  %v208_v12 = vsub.s32 %v205_v8, %v207_v9  ;;  %v509_v13 = vld.sshfl [vmem:[%s150_s18] sm:$0x11 pattern:$0x75316420] }
  0x11   : > { %381 = vmatprep.subr.bf16.mxu0 %v559_v2  ;;  %v202_v14 = vcombine.high %v509_v13, %v509_v13  ;;  %v567_v16 = vld [vmem:[%s642_s14 + $0x40] ss:$8 sps:$4 sm:$0xff]   ;;  %v568_v17 = vld [vmem:[%s642_s14 + $0x34] ss:$8 sps:$4 sm:$0xff]   ;;  %v570_v19 = vld [vmem:[%s642_s14 + $0x30] ss:$8 sps:$4 sm:$0xff]  }
  0x12   : > { %v209_v15 = vrot.slane %v509_v13, %v208_v12  ;;  %v571_v20 = vld [vmem:[%s642_s14 + $0x24] ss:$8 sps:$4 sm:$0xff]   ;;  %v573_v21 = vld [vmem:[%s642_s14 + $0x20] ss:$8 sps:$4 sm:$0xff]   ;;  %v574_v22 = vld [vmem:[%s642_s14 + $0x14] ss:$8 sps:$4 sm:$0xff]  }
  0x13   : > { %v216_v18 = vrot.slane %v202_v14, %v208_v12  ;;  %v576_v23 = vld [vmem:[%s642_s14 + $0x10] ss:$8 sps:$4 sm:$0xff]   ;;  %v577_v24 = vld [vmem:[%s642_s14 + $0x4] ss:$8 sps:$4 sm:$0xff]   ;;  %v579_v25 = vld [vmem:[%s642_s14] ss:$8 sps:$4 sm:$0xff]  }
  0x14   : > { %v580_v26 = vld [vmem:[%s642_s14 + $0xf4] ss:$8 sps:$4 sm:$0xff]   ;;  %v582_v27 = vld [vmem:[%s642_s14 + $0xf0] ss:$8 sps:$4 sm:$0xff]   ;;  %v583_v28 = vld [vmem:[%s642_s14 + $0xe4] ss:$8 sps:$4 sm:$0xff]  }
  0x15   : > { %411 = vmatprep.mubr.bf16.mxu0 %v216_v18  ;;  %v585_v29 = vld [vmem:[%s642_s14 + $0xe0] ss:$8 sps:$4 sm:$0xff]   ;;  %v586_v30 = vld [vmem:[%s642_s14 + $0xd4] ss:$8 sps:$4 sm:$0xff]   ;;  %v588_v31 = vld [vmem:[%s642_s14 + $0xd0] ss:$8 sps:$4 sm:$0xff]  }
  0x16   : > { %v589_v32 = vld [vmem:[%s642_s14 + $0xc4] ss:$8 sps:$4 sm:$0xff]   ;;  %v591_v33 = vld [vmem:[%s642_s14 + $0xc0] ss:$8 sps:$4 sm:$0xff]   ;;  %v592_v34 = vld [vmem:[%s642_s14 + $0xb4] ss:$8 sps:$4 sm:$0xff]  }
  0x17   : > { %v594_v35 = vld [vmem:[%s642_s14 + $0xb0] ss:$8 sps:$4 sm:$0xff]   ;;  %v595_v36 = vld [vmem:[%s642_s14 + $0xa4] ss:$8 sps:$4 sm:$0xff]   ;;  %v597_v37 = vld [vmem:[%s642_s14 + $0xa0] ss:$8 sps:$4 sm:$0xff]  }
  0x18   : > { %382 = vmatpush1.bf16.xpose.msra.mxu0 %v561_v3  ;;  %v598_v38 = vld [vmem:[%s642_s14 + $0x94] ss:$8 sps:$4 sm:$0xff]   ;;  %v600_v39 = vld [vmem:[%s642_s14 + $0x90] ss:$8 sps:$4 sm:$0xff]   ;;  %v601_v40 = vld [vmem:[%s642_s14 + $0x84] ss:$8 sps:$4 sm:$0xff]  }
  0x19   : > { %383 = vmatprep.subr.bf16.mxu0 %v562_v4  ;;  %v603_v41 = vld [vmem:[%s642_s14 + $0x80] ss:$8 sps:$4 sm:$0xff]   ;;  %s546_s19 = sshll.u32 %s691_s10, 2 }
  0x1a   : > { %s160_s22 = scalar_lea.vmem %s689_s2, %s546_s19 }
  0x20   : > { %384 = vmatpush1.bf16.xpose.msra.mxu0 %v564_v10 }
  0x21   : > { %385 = vmatprep.subr.bf16.mxu0 %v565_v11 }
  0x28   : > { %386 = vmatpush1.bf16.xpose.msra.mxu0 %v567_v16 }
  0x29   : > { %387 = vmatprep.subr.bf16.mxu0 %v568_v17 }
  0x30   : > { %388 = vmatpush1.bf16.xpose.msra.mxu0 %v570_v19 }
  0x31   : > { %389 = vmatprep.subr.bf16.mxu0 %v571_v20 }
  0x38   : > { %390 = vmatpush1.bf16.xpose.msra.mxu0 %v573_v21 }
  0x39   : > { %391 = vmatprep.subr.bf16.mxu0 %v574_v22 }
  0x40   : > { %392 = vmatpush1.bf16.xpose.msra.mxu0 %v576_v23 }
  0x41   : > { %393 = vmatprep.subr.bf16.mxu0 %v577_v24 }
  0x48   : > { %394 = vmatpush1.bf16.xpose.msra.mxu0 %v579_v25 }
  0x49   : > { %395 = vmatprep.subr.bf16.mxu0 %v580_v26 }
  0x50   : > { %396 = vmatpush2.bf16.xpose.msra.mxu0 %v582_v27 }
  0x51   : > { %397 = vmatprep.subr.bf16.mxu0 %v583_v28 }
  0x58   : > { %398 = vmatpush2.bf16.xpose.msra.mxu0 %v585_v29 }
  0x59   : > { %399 = vmatprep.subr.bf16.mxu0 %v586_v30 }
  0x60   : > { %400 = vmatpush2.bf16.xpose.msra.mxu0 %v588_v31 }
  0x61   : > { %401 = vmatprep.subr.bf16.mxu0 %v589_v32 }
  0x68   : > { %402 = vmatpush2.bf16.xpose.msra.mxu0 %v591_v33 }
  0x69   : > { %403 = vmatprep.subr.bf16.mxu0 %v592_v34 }
  0x70   : > { %404 = vmatpush2.bf16.xpose.msra.mxu0 %v594_v35 }
  0x71   : > { %405 = vmatprep.subr.bf16.mxu0 %v595_v36 }
  0x78   : > { %406 = vmatpush2.bf16.xpose.msra.mxu0 %v597_v37 }
  0x79   : > { %407 = vmatprep.subr.bf16.mxu0 %v598_v38 }
  0x80   : > { %408 = vmatpush2.bf16.xpose.msra.mxu0 %v600_v39 }
  0x81   : > { %409 = vmatprep.subr.bf16.mxu0 %v601_v40 }
  0x88   : > { %410 = vmatpush2.bf16.xpose.msra.mxu0 %v603_v41 }
  0x8f   : > { %412 = vmatmul.mubr.bf16.vlgmr.msra.gmra.mxu0 %v209_v15 }
 0x14f   : > { %v413_v42 = vpop.f32.mrf.mxu0 }
 0x151   : > { %v415_v43 = vpop.f32.mrf.mxu0 }
 0x152   : > { %v422_v44 = vcombine.low %v413_v42, %v415_v43 }
 0x153   : > { %v417_v45 = vpop.f32.mrf.mxu0 }
 0x154   : > { %542 = vst.sshfl [vmem:[%s160_s22] sm:$0x33 pattern:$0x76325410] %v422_v44 }
 0x155   : > { %v418_v46 = vpop.f32.mrf.mxu0 }
 0x156 PF: > { %s12_s9 = sadd.s32 1, %s610_s9  }
 0x157   : > { %p9_p4 = scmp.ge.s32.totalorder %s12_s9, 4  }
 0x159   :  { %11 = sbr.rel (!%p9_p4) target bundleno = 1 (0x1), region = 61 }

// kernel: _forward_impl.9
= control target key start
LH: loop header
LB: loop body
LE: loop exit
PB: predicated region body
PF: predicated region fallthrough
CT: control target
= control target key end

     0   :  { %9 = vsyncpa [#allocation3], 0  ;;  %s810_s15 = smov 0   ;;  %s881_s0 = inlined_call_operand.vmem [shape: f32[2,2], index: 0, kind: input, shape index: {}]   ;;  %s882_s1 = inlined_call_operand.vmem [shape: f32[2,2,16,16], index: 1, kind: input, shape index: {}]   ;;  %s883_s2 = inlined_call_operand.vmem [shape: f32[16,16], index: 2, kind: input, shape index: {}, may-alias: {2,3}]   ;;  %s884_s3 = inlined_call_operand.vmem [shape: f32[16,16], index: 3, kind: input, shape index: {}, may-alias: {2,3}]   ;;  %s885_s4 = inlined_call_operand.vmem [shape: f32[2,2,16,16], index: 4, kind: output, shape index: {}]  }
   0x1 LB: > { %s816_s16 = sadd.s32 4294967295, %s782_s15   ;;  %p648_p0 = scmp.ge.s32.totalorder %s782_s15, 1  ;;  %s782_s15 = sphi %s810_s15, %s15_s15  }
   0x2   : > { %p135_p1 = scmp.lt.s32.totalorder %s782_s15, 3  ;;  %s148_s19 = sshll.u32 %s881_s0, 4  ;;  %s149_s19 = int_to_ptr.vmem [resolvable:$true] %s148_s19 }
   0x3   : > { %p730_p3 = scmp.eq.s32.totalorder %s816_s16, 0  ;;  %s757_s21 = scalar_lea.vmem %s149_s19, 32 }
   0x4   : > { %p823_p2 = pnand %p648_p0, %p135_p1  ;;  %p758_p6 = scmp.ne.s32.totalorder %s149_s19, %s757_s21 }
   0x5   : > { %p765_p10 = scmp.lt.s32.totalorder %s149_s19, %s149_s19  ;;  %p766_p11 = scmp.lt.s32.totalorder %s757_s21, %s757_s21 }
   0x6   : > { %p726_p4 = pneg %p823_p2 }
   0x7   : > { %p767_p12 = por %p766_p11, %p765_p10 }
   0x8   : > { %p727_p5 = pnand %p730_p3, %p726_p4 }
   0xa   : > { %p759_p7 = pneg %p727_p5 }
   0xc   : > { %p760_p8 = pnand %p759_p7, %p758_p6 }
   0xe   : > { %p761_p9 = pneg %p760_p8 }
  0x10   : > { %p768_p13 = pnand %p767_p12, %p761_p9 }
  0x12   : > { %771 = shalt.err (!%p768_p13)
}
  0x13   : > { %s784_s22 = smov [#allocation2]   ;;  %175 = sbr.rel (%p823_p2) target bundleno = 466 (0x1d2), region = 36 }
  0x14   : > { %729 = dma.vmem_to_smem (!%p727_p5), %s149_s19, 32, %s784_s22, [#allocation3]  }
  0x18   : > { %777 = dma.done.wait (%p730_p3), [#allocation3], 32  }
  0x19   : > { %779 = vsyncadd (%p730_p3), [#allocation3], 4294967264 }
  0x1a   : > { %181 = sfence }
  0x1b   : > { %v213_v0 = vld [vmem:[%s883_s2 + $0x8] sm:$0xff]  ;;  %v212_v1 = vld [vmem:[%s883_s2] sm:$0xff]  ;;  %p202_p0 = scmp.lt.s32.totalorder %s816_s16, 1  ;;  %vm218_vm0 = vcmask 130048   ;;  %s663_s10 = sshll.u32 %s816_s16, 7 }
  0x1c   : > { %694 = vmatprep.subr.mxu0 %v213_v0  ;;  %v214_v6 = vld [vmem:[%s884_s3] sm:$0xff]  ;;  %v215_v9 = vld [vmem:[%s884_s3 + $0x8] sm:$0xff]  ;;  %s394_s11 = sld [smem:[#allocation2 + %s663_s10]]  ;;  %s571_s12 = sadd.s32 1, %s663_s10 }
  0x1d   : > { %695 = vmatpush3.msra.mxu0 %v213_v0  ;;  %s846_s27 = scalar_select %p202_p0, %s816_s16, 1  ;;  %705 = vmatprep.mubr.msk.f32.mxu1 %vm218_vm0, %v214_v6 }
  0x1e   : > { %696 = vmatprep.subr.mxu0 %v212_v1  ;;  %s572_s13 = sld [smem:[#allocation2 + %s571_s12]] }
  0x1f   : > { %697 = vmatpush3.msra.mxu0 %v212_v1  ;;  %s676_s28 = sshll.u32 %s846_s27, 5 }
  0x20   : > { %s206_s5 = scalar_lea.vmem %s882_s1, %s676_s28  ;;  %708 = vmatprep.subr.mxu0 %v213_v0  ;;  %s211_s18 = scalar_lea.vmem %s885_s4, %s676_s28 }
  0x21   : > { %v216_v2 = vld [vmem:[%s206_s5] sm:$0xff]  ;;  %v217_v3 = vld [vmem:[%s206_s5 + $0x8] sm:$0xff]  ;;  %v664_v4 = vld [vmem:[%s206_s5 + $0x10] sm:$0xff] }
  0x22   : > { %698 = vmatprep.mubr.msk.f32.mxu0 %vm218_vm0, %v216_v2  ;;  %v665_v5 = vld [vmem:[%s206_s5 + $0x18] sm:$0xff]  ;;  %v395_v28 = vstv %s394_s11 }
  0x23   : > { %699 = vmatmul.mubr.msk.f32.vlgmr.msra.gmra.mxu0 %vm218_vm0, %v217_v3 }
  0x24   : > { %709 = vmatpush3.msra.mxu0 %v213_v0  ;;  %712 = vmatprep.mubr.msk.f32.mxu0 %vm218_vm0, %v664_v4  ;;  %v573_v32 = vstv %s572_s13 }
  0x25   : > { %710 = vmatprep.subr.mxu0 %v212_v1 }
  0x26   : > { %711 = vmatpush3.msra.mxu0 %v212_v1 }
  0x27   : > { %713 = vmatmul.mubr.msk.f32.vlgmr.msra.gmra.mxu0 %vm218_vm0, %v665_v5 }
  0xe3   : > { %v700_v7 = vpop.f32.mrf.mxu0 }
  0xe4   : > { %701 = vmatprep.subr.mxu1 %v700_v7 }
  0xe5   : > { %v291_v8 = vpop.f32.mrf.mxu0  ;;  %702 = vmatpush3.msra.mxu1 %v700_v7 }
  0xe6   : > { %703 = vmatprep.subr.mxu1 %v291_v8 }
  0xe7   : > { %704 = vmatpush3.msra.mxu1 %v291_v8  ;;  %v714_v10 = vpop.f32.mrf.mxu0 }
  0xe8   : > { %706 = vmatmul.mubr.msk.f32.vlgmr.msra.gmra.mxu1 %vm218_vm0, %v215_v9  ;;  %715 = vmatprep.subr.mxu1 %v714_v10 }
  0xe9   : > { %v475_v11 = vpop.f32.mrf.mxu0  ;;  %716 = vmatpush3.msra.mxu1 %v714_v10  ;;  %719 = vmatprep.mubr.msk.f32.mxu1 %vm218_vm0, %v214_v6 }
  0xea   : > { %717 = vmatprep.subr.mxu1 %v475_v11 }
  0xeb   : > { %718 = vmatpush3.msra.mxu1 %v475_v11 }
  0xec   : > { %720 = vmatmul.mubr.msk.f32.vlgmr.msra.gmra.mxu1 %vm218_vm0, %v215_v9 }
 0x1a8   : > { %v707_v12 = vpop.f32.mrf.mxu1 }
 0x1a9   : > { %v662_v13 = vmul.f32 -1.442695, %v707_v12 }
 0x1aa   : > { %v372_v14 = vpop.f32.mrf.mxu1 }
 0x1ab   : > { %741 = vpow2.f32 %v662_v13  ;;  %v661_v15 = vmul.f32 -1.442695, %v372_v14 }
 0x1ac   : > { %v721_v16 = vpop.f32.mrf.mxu1 }
 0x1ad   : > { %743 = vpow2.f32 %v661_v15  ;;  %v671_v17 = vmul.f32 -1.442695, %v721_v16 }
 0x1ae   : > { %v550_v18 = vpop.f32.mrf.mxu1 }
 0x1af   : > { %745 = vpow2.f32 %v671_v17  ;;  %v670_v19 = vmul.f32 -1.442695, %v550_v18 }
 0x1b1   : > { %747 = vpow2.f32 %v670_v19 }
 0x1b8   : > { %v742_v20 = vpop.eup %741 }
 0x1b9   : > { %v388_v21 = vadd.f32 1.0, %v742_v20 }
 0x1ba   : > { %v744_v22 = vpop.eup %743 }
 0x1bb   : > { %749 = vrcp.f32 %v388_v21  ;;  %v387_v23 = vadd.f32 1.0, %v744_v22 }
 0x1bc   : > { %v746_v24 = vpop.eup %745 }
 0x1bd   : > { %751 = vrcp.f32 %v387_v23  ;;  %v566_v25 = vadd.f32 1.0, %v746_v24 }
 0x1be   : > { %v748_v26 = vpop.eup %747 }
 0x1bf   : > { %753 = vrcp.f32 %v566_v25  ;;  %v565_v27 = vadd.f32 1.0, %v748_v26 }
 0x1c1   : > { %755 = vrcp.f32 %v565_v27 }
 0x1c8   : > { %v750_v29 = vpop.eup %749 }
 0x1c9   : > { %v397_v30 = vmul.f32 %v750_v29, %v395_v28 }
 0x1ca   : > { %v752_v31 = vpop.eup %751 }
 0x1cb   : > { %399 = vst.msk [vmem:[%s211_s18 + $0x8] sm:$0xff] %vm218_vm0, %v397_v30  ;;  %v396_v33 = vmul.f32 %v752_v31, %v395_v28 }
 0x1cc   : > { %v754_v34 = vpop.eup %753 }
 0x1cd   : > { %398 = vst.msk [vmem:[%s211_s18] sm:$0xff] %vm218_vm0, %v396_v33  ;;  %v575_v35 = vmul.f32 %v754_v34, %v573_v32 }
 0x1ce   : > { %v756_v36 = vpop.eup %755 }
 0x1cf   : > { %673 = vst.msk [vmem:[%s211_s18 + $0x18] sm:$0xff] %vm218_vm0, %v575_v35  ;;  %v574_v37 = vmul.f32 %v756_v36, %v573_v32 }
 0x1d1   : > { %672 = vst.msk [vmem:[%s211_s18 + $0x10] sm:$0xff] %vm218_vm0, %v574_v37 }
 0x1d2 PF: > { %s15_s15 = sadd.s32 1, %s782_s15  }
 0x1d3   : > { %p12_p1 = scmp.ge.s32.totalorder %s15_s15, 4  }
 0x1d5   :  { %14 = sbr.rel (!%p12_p1) target bundleno = 1 (0x1), region = 73 }
 0x1da   :  { %600 = vsyncpa [#allocation3], 1 }
 0x1db   :  { %602 = vsyncpa [#allocation3 + $0x1], 1 }

</bundles_post_ra>
